<compile_context>
chip_gen: v7x
topology: tpu7x:2x2x1
jax: 0.10.0
libtpu: 0.0.40
codegen_flags: <defaults>
</compile_context>

<pallas_src>
import functools

import jax
import jax.numpy as jnp
from jax.experimental import pallas as pl
from jax.experimental.pallas import tpu as pltpu

_LANE = 128


def _round_up(v, m):
    return ((v + m - 1) // m) * m


def _default_epilogue_dtype():
    """bf16 bias/ReLU on bf16-capable VPUs (v6e/v7x), f32 elsewhere (v5e, older)."""
    try:
        kind = jax.devices()[0].device_kind.lower()
    except Exception:  # pragma: no cover - conservative fallback
        return jnp.float32
    if "v6" in kind or "v7" in kind:
        return jnp.bfloat16
    return jnp.float32


def _pick_batch_tile(batch, *, max_tile=1024):
    """Even number of tiles (balances v7x's 2 TCs), each <= max_tile rows, mult of 8."""
    if batch <= 16:
        return _round_up(max(batch, 8), 8)        # too small to split usefully
    # smallest EVEN tile count whose tiles fit under max_tile
    n_tiles = max(2, 2 * pl.cdiv(pl.cdiv(batch, max_tile), 2))
    return _round_up(pl.cdiv(batch, n_tiles), 8)


def _const_block_spec(block_shape, index_map, single_buffer):
    """BlockSpec for operands whose index map is constant across the grid.

    Single-buffering them (pl.Buffered(1)) frees VMEM and removes per-step
    double-buffer bookkeeping; falls back to a plain BlockSpec if unsupported.
    """
    if single_buffer:
        try:
            return pl.BlockSpec(block_shape, index_map,
                                pipeline_mode=pl.Buffered(1))
        except TypeError:
            pass
    return pl.BlockSpec(block_shape, index_map)


def _ffnet_kernel(x_ref, w_ref, b_ref, out_ref, *, epilogue_dtype):
    """Fused forward: 4 x (matmul + bias + ReLU) + final matmul + bias.

    x_ref:   (batch_tile, P)  compute dtype (bf16)
    w_ref:   (5, P, P)        compute dtype, pre-transposed [in, out], zero-padded
    b_ref:   (8, P)           float32 (rows 0..4 hold the biases, rest zero)
    out_ref: (batch_tile, P)  out dtype (columns >= num_outputs are padding)
    """
    compute_dtype = w_ref.dtype
    b_f32 = b_ref[...]                              # (8, P) f32
    b_ep = b_f32.astype(epilogue_dtype)             # no-op when epilogue is f32

    h = x_ref[...]
    for layer in range(4):
        z = jnp.dot(h, w_ref[layer], preferred_element_type=jnp.float32)
        # bias add + ReLU in the epilogue dtype (bf16 on v6e/v7x, f32 on v5e),
        # then cast back to the MXU feed dtype.
        z = z.astype(epilogue_dtype) + b_ep[layer:layer + 1, :]
        h = jnp.maximum(z, 0.0).astype(compute_dtype)

    # Final layer: keep the bias add in f32 (argmax near-tie robustness), cast once.
    y = jnp.dot(h, w_ref[4], preferred_element_type=jnp.float32) + b_f32[4:5, :]
    out_ref[...] = y.astype(out_ref.dtype)


def init_ffnetwork_params(key, num_inputs, num_outputs, hn):
    """Deterministic init matching torch.nn.Linear's default U(-1/sqrt(fan_in), +)."""
    nh2 = int(hn / 2)
    dims = [(num_inputs, hn), (hn, hn), (hn, hn), (hn, nh2), (nh2, num_outputs)]
    params = {}
    for idx, (fan_in, fan_out) in enumerate(dims, start=1):
        key, kw, kb = jax.random.split(key, 3)
        bound = 1.0 / (fan_in ** 0.5)
        # stored as [in, out] (transpose of torch's [out, in]); math is identical.
        params[f"w{idx}"] = jax.random.uniform(
            kw, (fan_in, fan_out), jnp.float32, minval=-bound, maxval=bound)
        params[f"b{idx}"] = jax.random.uniform(
            kb, (1, fan_out), jnp.float32, minval=-bound, maxval=bound)
    return params


def prepare_ffnetwork_params(params, compute_dtype=jnp.bfloat16):
    """Pads every feature dim to a multiple of 128 and stacks layers (do once).

    Zero padding keeps the math exact: padded weight rows contribute nothing and
    padded output columns are ReLU(0)=0 (or sliced off for the last layer).
    """
    num_inputs = params["w1"].shape[0]
    num_outputs = params["w5"].shape[1]
    widths = [num_inputs] + [params[f"w{i}"].shape[1] for i in range(1, 6)]
    P = _round_up(max(widths), _LANE)

    w_stack = jnp.stack([
        jnp.pad(params[f"w{i}"],
                ((0, P - params[f"w{i}"].shape[0]),
                 (0, P - params[f"w{i}"].shape[1])))
        for i in range(1, 6)
    ]).astype(compute_dtype)

    b_stack = jnp.pad(
        jnp.concatenate(
            [jnp.pad(params[f"b{i}"], ((0, 0), (0, P - params[f"b{i}"].shape[1])))
             for i in range(1, 6)],
            axis=0),
        ((0, 3), (0, 0))).astype(jnp.float32)          # (8, P), sublane-aligned

    return {"w": w_stack, "b": b_stack,
            "num_inputs": num_inputs, "num_outputs": num_outputs,
            "padded_width": P}


def ffnetwork_forward_padded(x_pad, prepared, *, batch_tile,
                             out_dtype=jnp.bfloat16, epilogue_dtype=None,
                             single_buffer_constants=True):
    """Fast path: x_pad is (B_pad, P) already in the compute dtype with
    B_pad % batch_tile == 0. Returns the padded (B_pad, P) output slab so the
    caller/XLA can fuse any slice into the consumer (no standalone slice kernel).

    For best end-to-end latency keep this call inside the larger jitted RL step
    (or batch several policy evaluations into one call) so the weight DMA and
    launch overhead are amortized across the whole batch.
    """
    B_pad, P = x_pad.shape
    w_stack, b_stack = prepared["w"], prepared["b"]
    compute_dtype = w_stack.dtype
    assert P == prepared["padded_width"]
    assert x_pad.dtype == compute_dtype
    assert batch_tile % 8 == 0 and B_pad % batch_tile == 0
    if epilogue_dtype is None:
        epilogue_dtype = _default_epilogue_dtype()
    num_tiles = B_pad // batch_tile

    in_isz = jnp.dtype(compute_dtype).itemsize
    out_isz = jnp.dtype(out_dtype).itemsize
    cost = pl.CostEstimate(
        flops=2 * B_pad * 5 * P * P,
        transcendentals=0,
        bytes_accessed=(B_pad * P * in_isz        # x
                        + 5 * P * P * in_isz      # weights
                        + 8 * P * 4               # biases
                        + B_pad * P * out_isz))   # output

    kernel = functools.partial(_ffnet_kernel, epilogue_dtype=epilogue_dtype)

    return pl.pallas_call(
        kernel,
        out_shape=jax.ShapeDtypeStruct((B_pad, P), out_dtype),
        grid_spec=pltpu.PrefetchScalarGridSpec(
            num_scalar_prefetch=0,
            grid=(num_tiles,),
            in_specs=[
                pl.BlockSpec((batch_tile, P), lambda i: (i, 0)),
                _const_block_spec((5, P, P), lambda i: (0, 0, 0),
                                  single_buffer_constants),
                _const_block_spec((8, P), lambda i: (0, 0),
                                  single_buffer_constants),
            ],
            out_specs=pl.BlockSpec((batch_tile, P), lambda i: (i, 0)),
        ),
        compiler_params=pltpu.CompilerParams(
            dimension_semantics=("parallel",)),   # shards batch tiles across TCs
        cost_estimate=cost,
    )(x_pad, w_stack, b_stack)


def ffnetwork_forward(x, prepared, *, batch_tile=None,
                      out_dtype=jnp.bfloat16, epilogue_dtype=None,
                      single_buffer_constants=True):
    """Convenience wrapper: x [B, num_inputs] f32 -> [B, num_outputs] (out_dtype).

    Does the layout plumbing (pad/cast in, slice out) around the padded fast path.
    Callers that keep observations in the padded layout should call
    ffnetwork_forward_padded directly to avoid these extra HBM passes.
    """
    B, num_inputs = x.shape
    P = prepared["padded_width"]
    num_outputs = prepared["num_outputs"]
    compute_dtype = prepared["w"].dtype

    if batch_tile is None:
        batch_tile = _pick_batch_tile(B)
    assert batch_tile % 8 == 0, "batch_tile must be a multiple of 8 sublanes"
    num_tiles = pl.cdiv(B, batch_tile)
    B_pad = num_tiles * batch_tile

    # Lane-dense, tile-aligned input slab (padded rows/cols are zeros).
    x_pad = jnp.pad(x, ((0, B_pad - B), (0, P - num_inputs))).astype(compute_dtype)

    out = ffnetwork_forward_padded(
        x_pad, prepared, batch_tile=batch_tile, out_dtype=out_dtype,
        epilogue_dtype=epilogue_dtype,
        single_buffer_constants=single_buffer_constants)
    return out[:B, :num_outputs]


def ffnetwork_reference(x, params):
    """Plain-JAX f32 reference for correctness checking."""
    h = x
    for idx in range(1, 5):
        h = jnp.maximum(h @ params[f"w{idx}"] + params[f"b{idx}"], 0.0)
    y = h @ params["w5"] + params["b5"]
    return y.reshape(y.shape[0], -1)


if __name__ == "__main__":
    # Small hockey-ish shapes. batch=64 exercises the adaptive even-tile split
    # (2 tiles of 32 rows -> both v7x TensorCores get work) and the padding paths.
    batch = 64
    num_inputs = 18
    num_outputs = 8
    hn = 64

    key = jax.random.PRNGKey(0)
    key, kx = jax.random.split(key)
    x = jax.random.normal(kx, (batch, num_inputs), jnp.float32)

    params = init_ffnetwork_params(key, num_inputs, num_outputs, hn)
    prepared = prepare_ffnetwork_params(params)   # bf16 weights, 128-lane padding

    try:
        out = jax.block_until_ready(ffnetwork_forward(x, prepared))
    except Exception:
        # Extremely defensive: if this jax build rejects single-buffered constant
        # operands at lowering time, retry with standard double-buffered specs.
        out = jax.block_until_ready(
            ffnetwork_forward(x, prepared, single_buffer_constants=False))

    ref = ffnetwork_reference(x, params)
    assert out.shape == (batch, num_outputs)
    out_f32 = out.astype(jnp.float32)
    max_err = float(jnp.max(jnp.abs(out_f32 - ref)))
    # bf16 matmul feed + bf16 output writeback with f32 accumulation.
    assert jnp.allclose(out_f32, ref, atol=2.5e-2, rtol=2.5e-2), (
        f"mismatch vs reference (max abs err {max_err:.4g})")
    print("KERNEL_OK")
</pallas_src>

<mosaic_0001>
module attributes {stable_mosaic.version = 11 : i64} {
  func.func @_ffnet_kernel(%arg0: i32, %arg1: memref<32x128xbf16, #tpu.memory_space<vmem>>, %arg2: memref<5x128x128xbf16, #tpu.memory_space<vmem>>, %arg3: memref<8x128xf32, #tpu.memory_space<vmem>>, %arg4: memref<32x128xbf16, #tpu.memory_space<vmem>>) attributes {dimension_semantics = [#tpu.dimension_semantics<parallel>], iteration_bounds = array<i64: 2>, scalar_prefetch = 0 : i64, scratch_operands = 0 : i64, tpu.core_type = #tpu.core_type<tc>, window_params = [{transform_indices = @transform_0, window_bounds = array<i64: 32, 128>}, {pipeline_mode = #tpu.pipeline_mode<synchronous>, transform_indices = @transform_1, window_bounds = array<i64: 5, 128, 128>}, {pipeline_mode = #tpu.pipeline_mode<synchronous>, transform_indices = @transform_2, window_bounds = array<i64: 8, 128>}, {transform_indices = @transform_3, window_bounds = array<i64: 32, 128>}]} {
    %c0 = arith.constant 0 : index
    %c0_0 = arith.constant 0 : index
    %0 = vector.load %arg3[%c0, %c0_0] : memref<8x128xf32, #tpu.memory_space<vmem>>, vector<8x128xf32>
    %c0_1 = arith.constant 0 : index
    %c0_2 = arith.constant 0 : index
    %1 = vector.load %arg1[%c0_1, %c0_2] : memref<32x128xbf16, #tpu.memory_space<vmem>>, vector<32x128xbf16>
    %c0_3 = arith.constant 0 : index
    %c0_4 = arith.constant 0 : index
    %c0_5 = arith.constant 0 : index
    %2 = vector.load %arg2[%c0_3, %c0_4, %c0_5] : memref<5x128x128xbf16, #tpu.memory_space<vmem>>, vector<1x128x128xbf16>
    %3 = vector.shape_cast %2 : vector<1x128x128xbf16> to vector<128x128xbf16>
    %cst = arith.constant dense<0.000000e+00> : vector<32x128xf32>
    %4 = tpu.matmul %1, %3, %cst {dimension_numbers = #tpu.dot_dimension_numbers<[1], [0], [0], [1], [0, 0, 1, 1], [], []>} : vector<32x128xbf16>, vector<128x128xbf16>, vector<32x128xf32> -> vector<32x128xf32>
    %5 = vector.extract_strided_slice %0 {offsets = [0, 0], sizes = [1, 128], strides = [1, 1]} : vector<8x128xf32> to vector<1x128xf32>
    %6 = vector.broadcast %5 : vector<1x128xf32> to vector<32x128xf32>
    %7 = arith.addf %4, %6 : vector<32x128xf32>
    %cst_6 = arith.constant 0.000000e+00 : f32
    %8 = vector.broadcast %cst_6 : f32 to vector<32x128xf32>
    %9 = arith.maximumf %7, %8 : vector<32x128xf32>
    %10 = arith.truncf %9 : vector<32x128xf32> to vector<32x128xbf16>
    %c1 = arith.constant 1 : index
    %c0_7 = arith.constant 0 : index
    %c0_8 = arith.constant 0 : index
    %11 = vector.load %arg2[%c1, %c0_7, %c0_8] : memref<5x128x128xbf16, #tpu.memory_space<vmem>>, vector<1x128x128xbf16>
    %12 = vector.shape_cast %11 : vector<1x128x128xbf16> to vector<128x128xbf16>
    %cst_9 = arith.constant dense<0.000000e+00> : vector<32x128xf32>
    %13 = tpu.matmul %10, %12, %cst_9 {dimension_numbers = #tpu.dot_dimension_numbers<[1], [0], [0], [1], [0, 0, 1, 1], [], []>} : vector<32x128xbf16>, vector<128x128xbf16>, vector<32x128xf32> -> vector<32x128xf32>
    %14 = vector.extract_strided_slice %0 {offsets = [1, 0], sizes = [1, 128], strides = [1, 1]} : vector<8x128xf32> to vector<1x128xf32>
    %15 = vector.broadcast %14 : vector<1x128xf32> to vector<32x128xf32>
    %16 = arith.addf %13, %15 : vector<32x128xf32>
    %cst_10 = arith.constant 0.000000e+00 : f32
    %17 = vector.broadcast %cst_10 : f32 to vector<32x128xf32>
    %18 = arith.maximumf %16, %17 : vector<32x128xf32>
    %19 = arith.truncf %18 : vector<32x128xf32> to vector<32x128xbf16>
    %c2 = arith.constant 2 : index
    %c0_11 = arith.constant 0 : index
    %c0_12 = arith.constant 0 : index
    %20 = vector.load %arg2[%c2, %c0_11, %c0_12] : memref<5x128x128xbf16, #tpu.memory_space<vmem>>, vector<1x128x128xbf16>
    %21 = vector.shape_cast %20 : vector<1x128x128xbf16> to vector<128x128xbf16>
    %cst_13 = arith.constant dense<0.000000e+00> : vector<32x128xf32>
    %22 = tpu.matmul %19, %21, %cst_13 {dimension_numbers = #tpu.dot_dimension_numbers<[1], [0], [0], [1], [0, 0, 1, 1], [], []>} : vector<32x128xbf16>, vector<128x128xbf16>, vector<32x128xf32> -> vector<32x128xf32>
    %23 = vector.extract_strided_slice %0 {offsets = [2, 0], sizes = [1, 128], strides = [1, 1]} : vector<8x128xf32> to vector<1x128xf32>
    %24 = vector.broadcast %23 : vector<1x128xf32> to vector<32x128xf32>
    %25 = arith.addf %22, %24 : vector<32x128xf32>
    %cst_14 = arith.constant 0.000000e+00 : f32
    %26 = vector.broadcast %cst_14 : f32 to vector<32x128xf32>
    %27 = arith.maximumf %25, %26 : vector<32x128xf32>
    %28 = arith.truncf %27 : vector<32x128xf32> to vector<32x128xbf16>
    %c3 = arith.constant 3 : index
    %c0_15 = arith.constant 0 : index
    %c0_16 = arith.constant 0 : index
    %29 = vector.load %arg2[%c3, %c0_15, %c0_16] : memref<5x128x128xbf16, #tpu.memory_space<vmem>>, vector<1x128x128xbf16>
    %30 = vector.shape_cast %29 : vector<1x128x128xbf16> to vector<128x128xbf16>
    %cst_17 = arith.constant dense<0.000000e+00> : vector<32x128xf32>
    %31 = tpu.matmul %28, %30, %cst_17 {dimension_numbers = #tpu.dot_dimension_numbers<[1], [0], [0], [1], [0, 0, 1, 1], [], []>} : vector<32x128xbf16>, vector<128x128xbf16>, vector<32x128xf32> -> vector<32x128xf32>
    %32 = vector.extract_strided_slice %0 {offsets = [3, 0], sizes = [1, 128], strides = [1, 1]} : vector<8x128xf32> to vector<1x128xf32>
    %33 = vector.broadcast %32 : vector<1x128xf32> to vector<32x128xf32>
    %34 = arith.addf %31, %33 : vector<32x128xf32>
    %cst_18 = arith.constant 0.000000e+00 : f32
    %35 = vector.broadcast %cst_18 : f32 to vector<32x128xf32>
    %36 = arith.maximumf %34, %35 : vector<32x128xf32>
    %37 = arith.truncf %36 : vector<32x128xf32> to vector<32x128xbf16>
    %c4 = arith.constant 4 : index
    %c0_19 = arith.constant 0 : index
    %c0_20 = arith.constant 0 : index
    %38 = vector.load %arg2[%c4, %c0_19, %c0_20] : memref<5x128x128xbf16, #tpu.memory_space<vmem>>, vector<1x128x128xbf16>
    %39 = vector.shape_cast %38 : vector<1x128x128xbf16> to vector<128x128xbf16>
    %cst_21 = arith.constant dense<0.000000e+00> : vector<32x128xf32>
    %40 = tpu.matmul %37, %39, %cst_21 {dimension_numbers = #tpu.dot_dimension_numbers<[1], [0], [0], [1], [0, 0, 1, 1], [], []>} : vector<32x128xbf16>, vector<128x128xbf16>, vector<32x128xf32> -> vector<32x128xf32>
    %41 = vector.extract_strided_slice %0 {offsets = [4, 0], sizes = [1, 128], strides = [1, 1]} : vector<8x128xf32> to vector<1x128xf32>
    %42 = vector.broadcast %41 : vector<1x128xf32> to vector<32x128xf32>
    %43 = arith.addf %40, %42 : vector<32x128xf32>
    %44 = arith.truncf %43 : vector<32x128xf32> to vector<32x128xbf16>
    %c0_22 = arith.constant 0 : index
    %c0_23 = arith.constant 0 : index
    %45 = vector.load %arg4[%c0_22, %c0_23] : memref<32x128xbf16, #tpu.memory_space<vmem>>, vector<32x128xbf16>
    tpu.vector_store %arg4[%c0_22, %c0_23], %44 {strides = array<i32>} : memref<32x128xbf16, #tpu.memory_space<vmem>>, vector<32x128xbf16>,
    return
  }
  func.func @transform_0(%arg0: i32) -> (i32, i32) {
    %c0_i32 = arith.constant 0 : i32
    %c0_i32_0 = arith.constant 0 : i32
    return %arg0, %c0_i32 : i32, i32
  }
  func.func @transform_1(%arg0: i32) -> (i32, i32, i32) {
    %c0_i32 = arith.constant 0 : i32
    %c0_i32_0 = arith.constant 0 : i32
    %c0_i32_1 = arith.constant 0 : i32
    %c0_i32_2 = arith.constant 0 : i32
    return %c0_i32, %c0_i32_0, %c0_i32_1 : i32, i32, i32
  }
  func.func @transform_2(%arg0: i32) -> (i32, i32) {
    %c0_i32 = arith.constant 0 : i32
    %c0_i32_0 = arith.constant 0 : i32
    %c0_i32_1 = arith.constant 0 : i32
    return %c0_i32, %c0_i32_0 : i32, i32
  }
  func.func @transform_3(%arg0: i32) -> (i32, i32) {
    %c0_i32 = arith.constant 0 : i32
    %c0_i32_0 = arith.constant 0 : i32
    return %arg0, %c0_i32 : i32, i32
  }
}

module attributes {stable_mosaic.version = 11 : i64} {
  func.func @_ffnet_kernel(%arg0: i32, %arg1: memref<32x128xbf16, #tpu.memory_space<vmem>>, %arg2: memref<5x128x128xbf16, #tpu.memory_space<vmem>>, %arg3: memref<8x128xf32, #tpu.memory_space<vmem>>, %arg4: memref<32x128xbf16, #tpu.memory_space<vmem>>) attributes {dimension_semantics = [#tpu.dimension_semantics<parallel>], iteration_bounds = array<i64: 2>, scalar_prefetch = 0 : i64, scratch_operands = 0 : i64, tpu.core_type = #tpu.core_type<tc>, window_params = [{transform_indices = @transform_0, window_bounds = array<i64: 32, 128>}, {pipeline_mode = #tpu.pipeline_mode<synchronous>, transform_indices = @transform_1, window_bounds = array<i64: 5, 128, 128>}, {pipeline_mode = #tpu.pipeline_mode<synchronous>, transform_indices = @transform_2, window_bounds = array<i64: 8, 128>}, {transform_indices = @transform_3, window_bounds = array<i64: 32, 128>}]} {
    %c0 = arith.constant 0 : index
    %c0_0 = arith.constant 0 : index
    %0 = vector.load %arg3[%c0, %c0_0] : memref<8x128xf32, #tpu.memory_space<vmem>>, vector<8x128xf32>
    %c0_1 = arith.constant 0 : index
    %c0_2 = arith.constant 0 : index
    %1 = vector.load %arg1[%c0_1, %c0_2] : memref<32x128xbf16, #tpu.memory_space<vmem>>, vector<32x128xbf16>
    %c0_3 = arith.constant 0 : index
    %c0_4 = arith.constant 0 : index
    %c0_5 = arith.constant 0 : index
    %2 = vector.load %arg2[%c0_3, %c0_4, %c0_5] : memref<5x128x128xbf16, #tpu.memory_space<vmem>>, vector<1x128x128xbf16>
    %3 = vector.shape_cast %2 : vector<1x128x128xbf16> to vector<128x128xbf16>
    %cst = arith.constant dense<0.000000e+00> : vector<32x128xf32>
    %4 = tpu.matmul %1, %3, %cst {dimension_numbers = #tpu.dot_dimension_numbers<[1], [0], [0], [1], [0, 0, 1, 1], [], []>} : vector<32x128xbf16>, vector<128x128xbf16>, vector<32x128xf32> -> vector<32x128xf32>
    %5 = vector.extract_strided_slice %0 {offsets = [0, 0], sizes = [1, 128], strides = [1, 1]} : vector<8x128xf32> to vector<1x128xf32>
    %6 = vector.broadcast %5 : vector<1x128xf32> to vector<32x128xf32>
    %7 = arith.addf %4, %6 : vector<32x128xf32>
    %cst_6 = arith.constant 0.000000e+00 : f32
    %8 = vector.broadcast %cst_6 : f32 to vector<32x128xf32>
    %9 = arith.maximumf %7, %8 : vector<32x128xf32>
    %10 = arith.truncf %9 : vector<32x128xf32> to vector<32x128xbf16>
    %c1 = arith.constant 1 : index
    %c0_7 = arith.constant 0 : index
    %c0_8 = arith.constant 0 : index
    %11 = vector.load %arg2[%c1, %c0_7, %c0_8] : memref<5x128x128xbf16, #tpu.memory_space<vmem>>, vector<1x128x128xbf16>
    %12 = vector.shape_cast %11 : vector<1x128x128xbf16> to vector<128x128xbf16>
    %cst_9 = arith.constant dense<0.000000e+00> : vector<32x128xf32>
    %13 = tpu.matmul %10, %12, %cst_9 {dimension_numbers = #tpu.dot_dimension_numbers<[1], [0], [0], [1], [0, 0, 1, 1], [], []>} : vector<32x128xbf16>, vector<128x128xbf16>, vector<32x128xf32> -> vector<32x128xf32>
    %14 = vector.extract_strided_slice %0 {offsets = [1, 0], sizes = [1, 128], strides = [1, 1]} : vector<8x128xf32> to vector<1x128xf32>
    %15 = vector.broadcast %14 : vector<1x128xf32> to vector<32x128xf32>
    %16 = arith.addf %13, %15 : vector<32x128xf32>
    %cst_10 = arith.constant 0.000000e+00 : f32
    %17 = vector.broadcast %cst_10 : f32 to vector<32x128xf32>
    %18 = arith.maximumf %16, %17 : vector<32x128xf32>
    %19 = arith.truncf %18 : vector<32x128xf32> to vector<32x128xbf16>
    %c2 = arith.constant 2 : index
    %c0_11 = arith.constant 0 : index
    %c0_12 = arith.constant 0 : index
    %20 = vector.load %arg2[%c2, %c0_11, %c0_12] : memref<5x128x128xbf16, #tpu.memory_space<vmem>>, vector<1x128x128xbf16>
    %21 = vector.shape_cast %20 : vector<1x128x128xbf16> to vector<128x128xbf16>
    %cst_13 = arith.constant dense<0.000000e+00> : vector<32x128xf32>
    %22 = tpu.matmul %19, %21, %cst_13 {dimension_numbers = #tpu.dot_dimension_numbers<[1], [0], [0], [1], [0, 0, 1, 1], [], []>} : vector<32x128xbf16>, vector<128x128xbf16>, vector<32x128xf32> -> vector<32x128xf32>
    %23 = vector.extract_strided_slice %0 {offsets = [2, 0], sizes = [1, 128], strides = [1, 1]} : vector<8x128xf32> to vector<1x128xf32>
    %24 = vector.broadcast %23 : vector<1x128xf32> to vector<32x128xf32>
    %25 = arith.addf %22, %24 : vector<32x128xf32>
    %cst_14 = arith.constant 0.000000e+00 : f32
    %26 = vector.broadcast %cst_14 : f32 to vector<32x128xf32>
    %27 = arith.maximumf %25, %26 : vector<32x128xf32>
    %28 = arith.truncf %27 : vector<32x128xf32> to vector<32x128xbf16>
    %c3 = arith.constant 3 : index
    %c0_15 = arith.constant 0 : index
    %c0_16 = arith.constant 0 : index
    %29 = vector.load %arg2[%c3, %c0_15, %c0_16] : memref<5x128x128xbf16, #tpu.memory_space<vmem>>, vector<1x128x128xbf16>
    %30 = vector.shape_cast %29 : vector<1x128x128xbf16> to vector<128x128xbf16>
    %cst_17 = arith.constant dense<0.000000e+00> : vector<32x128xf32>
    %31 = tpu.matmul %28, %30, %cst_17 {dimension_numbers = #tpu.dot_dimension_numbers<[1], [0], [0], [1], [0, 0, 1, 1], [], []>} : vector<32x128xbf16>, vector<128x128xbf16>, vector<32x128xf32> -> vector<32x128xf32>
    %32 = vector.extract_strided_slice %0 {offsets = [3, 0], sizes = [1, 128], strides = [1, 1]} : vector<8x128xf32> to vector<1x128xf32>
    %33 = vector.broadcast %32 : vector<1x128xf32> to vector<32x128xf32>
    %34 = arith.addf %31, %33 : vector<32x128xf32>
    %cst_18 = arith.constant 0.000000e+00 : f32
    %35 = vector.broadcast %cst_18 : f32 to vector<32x128xf32>
    %36 = arith.maximumf %34, %35 : vector<32x128xf32>
    %37 = arith.truncf %36 : vector<32x128xf32> to vector<32x128xbf16>
    %c4 = arith.constant 4 : index
    %c0_19 = arith.constant 0 : index
    %c0_20 = arith.constant 0 : index
    %38 = vector.load %arg2[%c4, %c0_19, %c0_20] : memref<5x128x128xbf16, #tpu.memory_space<vmem>>, vector<1x128x128xbf16>
    %39 = vector.shape_cast %38 : vector<1x128x128xbf16> to vector<128x128xbf16>
    %cst_21 = arith.constant dense<0.000000e+00> : vector<32x128xf32>
    %40 = tpu.matmul %37, %39, %cst_21 {dimension_numbers = #tpu.dot_dimension_numbers<[1], [0], [0], [1], [0, 0, 1, 1], [], []>} : vector<32x128xbf16>, vector<128x128xbf16>, vector<32x128xf32> -> vector<32x128xf32>
    %41 = vector.extract_strided_slice %0 {offsets = [4, 0], sizes = [1, 128], strides = [1, 1]} : vector<8x128xf32> to vector<1x128xf32>
    %42 = vector.broadcast %41 : vector<1x128xf32> to vector<32x128xf32>
    %43 = arith.addf %40, %42 : vector<32x128xf32>
    %44 = arith.truncf %43 : vector<32x128xf32> to vector<32x128xbf16>
    %c0_22 = arith.constant 0 : index
    %c0_23 = arith.constant 0 : index
    %45 = vector.load %arg4[%c0_22, %c0_23] : memref<32x128xbf16, #tpu.memory_space<vmem>>, vector<32x128xbf16>
    tpu.vector_store %arg4[%c0_22, %c0_23], %44 {strides = array<i32>} : memref<32x128xbf16, #tpu.memory_space<vmem>>, vector<32x128xbf16>,
    return
  }
  func.func @transform_0(%arg0: i32) -> (i32, i32) {
    %c0_i32 = arith.constant 0 : i32
    %c0_i32_0 = arith.constant 0 : i32
    return %arg0, %c0_i32 : i32, i32
  }
  func.func @transform_1(%arg0: i32) -> (i32, i32, i32) {
    %c0_i32 = arith.constant 0 : i32
    %c0_i32_0 = arith.constant 0 : i32
    %c0_i32_1 = arith.constant 0 : i32
    %c0_i32_2 = arith.constant 0 : i32
    return %c0_i32, %c0_i32_0, %c0_i32_1 : i32, i32, i32
  }
  func.func @transform_2(%arg0: i32) -> (i32, i32) {
    %c0_i32 = arith.constant 0 : i32
    %c0_i32_0 = arith.constant 0 : i32
    %c0_i32_1 = arith.constant 0 : i32
    return %c0_i32, %c0_i32_0 : i32, i32
  }
  func.func @transform_3(%arg0: i32) -> (i32, i32) {
    %c0_i32 = arith.constant 0 : i32
    %c0_i32_0 = arith.constant 0 : i32
    return %arg0, %c0_i32 : i32, i32
  }
}

</mosaic_0001>

<bundles_post_ra>
// kernel: tpu_custom_call.1
= control target key start
LH: loop header
LB: loop body
LE: loop exit
PB: predicated region body
PF: predicated region fallthrough
CT: control target
= control target key end

     0   :  { %8 = vsyncpa [#allocation3], 0  ;;  %s1767_s0 = inlined_call_operand.hbm [shape: bf16[64,128], index: 0, kind: input, shape index: {}]   ;;  %s1768_s1 = inlined_call_operand.hbm [shape: bf16[5,128,128], index: 1, kind: input, shape index: {}]   ;;  %s1769_s2 = inlined_call_operand.hbm [shape: f32[8,128], index: 2, kind: input, shape index: {}]   ;;  %s1770_s3 = inlined_call_operand.hbm [shape: bf16[64,128], index: 3, kind: output, shape index: {}]  }
   0x1   :  { %10 = vsyncpa [#allocation3 + $0x1], 0 }
   0x2   :  { %11 = vsyncpa [#allocation6], 0 }
   0x3   :  { %12 = vsyncpa [#allocation4], 0 }
   0x4   :  { %14 = vsyncpa [#allocation4 + $0x1], 0  ;;  %s1505_s12 = smov 0   ;;  %s1507_s13 = smov 0  }
   0x5   :  { %s1509_s14 = smov 0   ;;  %s1511_s15 = smov 0  }
   0x6 LB: > { %s1526_s16 = sadd.s32 4294967295, %s1475_s15   ;;  %s975_s17 = sadd.s32 4294967294, %s1475_s15   ;;  %s1475_s15 = sphi %s1511_s15, %s1790_s15   ;;  %s1471_s14 = sphi %s1509_s14, %s1789_s14   ;;  %s1467_s13 = sphi %s1507_s13, %s1788_s13   ;;  %s1463_s12 = sphi %s1505_s12, %s1787_s12  }
   0x7   : > { %p40_p0 = scmp.ne.s32.totalorder %s1467_s13, %s1463_s12  ;;  %p1771_p1 = scmp.eq.s32.totalorder %s1526_s16, 0 }
   0x8   : > { %p112_p3 = scmp.eq.s32.totalorder %s975_s17, 1  ;;  %p976_p5 = scmp.ge.s32.totalorder %s1475_s15, 1 }
   0x9   : > { %p1535_p4 = por %p1771_p1, %p40_p0  ;;  %p119_p7 = scmp.lt.s32.totalorder %s1475_s15, 3 }
   0xa   : > { %p1540_p6 = por %p112_p3, %p40_p0  ;;  %s1477_s21 = smov [#allocation5]  }
   0xb   : > { %s1774_s18 = scalar_select %p1535_p4, 1, 0 }
   0xc   : > { %s1775_s19 = scalar_select %p1540_p6, 1, 0 }
   0xd   : > { %p1545_p8 = pnand %p976_p5, %p119_p7  ;;  %s131_s22 = sshll.u32 %s1477_s21, 4  ;;  %s1549_s22 = int_to_ptr.vmem [resolvable:$true] %s131_s22 }
   0xe   : > { %s1478_s24 = smov [#allocation7]   ;;  %s1319_s28 = scalar_lea.hbm %s1768_s1, 5120 }
   0xf   : > { %p1218_p9 = pneg %p1545_p8  ;;  %s145_s25 = sshll.u32 %s1478_s24, 4  ;;  %s1560_s25 = int_to_ptr.vmem [resolvable:$true] %s145_s25 }
  0x10   : > { %p1320_p12 = scmp.ne.s32.totalorder %s1768_s1, %s1319_s28  ;;  %p1326_p5 = scmp.lt.u32.totalorder %s1319_s28, %s1768_s1 }
  0x11   : > { %p1556_p11 = pnand %p1218_p9, %p1771_p1 }
  0x13   : > { %p1321_p13 = pneg %p1556_p11 }
  0x15   : > { %p1322_p0 = pnand %p1321_p13, %p1320_p12 }
  0x17   : > { %p1323_p3 = pneg %p1322_p0 }
  0x19   : > { %p1328_p7 = pnand %p1326_p5, %p1323_p3 }
  0x1b   : > { %1331 = shalt.err (!%p1328_p7)
}
  0x1c   : > { %s1332_s6 = scalar_lea.vmem %s1549_s22, 5120  ;;  %p1340_p2 = scmp.lt.s32.totalorder %s1549_s22, %s1549_s22 }
  0x1d   : > { %p1333_p9 = scmp.ne.s32.totalorder %s1549_s22, %s1332_s6  ;;  %p1341_p12 = scmp.lt.s32.totalorder %s1332_s6, %s1332_s6 }
  0x1f   : > { %p1335_p10 = pnand %p1333_p9, %p1321_p13  ;;  %p1342_p0 = por %p1341_p12, %p1340_p2 }
  0x21   : > { %p1336_p1 = pneg %p1335_p10 }
  0x23   : > { %p1343_p6 = pnand %p1342_p0, %p1336_p1 }
  0x25   : > { %1346 = shalt.err (!%p1343_p6)
}
  0x26   : > { %s1479_s7 = smov 64   ;;  %s1480_s8 = smov 4  }
  0x27   : > { %1221 = dma.hbm_to_vmem [thread:$0]  (!%p1556_p11), %s1768_s1, 5120, %s1549_s22, [#allocation6], %s1479_s7, %s1479_s7, %s1480_s8  }
  0x28   : > { %s1347_s21 = scalar_lea.hbm %s1769_s2, 128 }
  0x29   : > { %p1348_p1 = scmp.ne.s32.totalorder %s1769_s2, %s1347_s21  ;;  %p1354_p10 = scmp.lt.u32.totalorder %s1347_s21, %s1769_s2 }
  0x2b   : > { %p1350_p2 = pnand %p1348_p1, %p1321_p13 }
  0x2d   : > { %p1351_p6 = pneg %p1350_p2 }
  0x2f   : > { %p1356_p3 = pnand %p1354_p10, %p1351_p6 }
  0x31   : > { %1359 = shalt.err (!%p1356_p3)
}
  0x32   : > { %s1360_s22 = scalar_lea.vmem %s1560_s25, 128  ;;  %p1368_p12 = scmp.lt.s32.totalorder %s1560_s25, %s1560_s25 }
  0x33   : > { %p1361_p5 = scmp.ne.s32.totalorder %s1560_s25, %s1360_s22  ;;  %p1369_p0 = scmp.lt.s32.totalorder %s1360_s22, %s1360_s22 }
  0x35   : > { %p1363_p7 = pnand %p1361_p5, %p1321_p13  ;;  %p1370_p1 = por %p1369_p0, %p1368_p12 }
  0x37   : > { %p1364_p9 = pneg %p1363_p7 }
  0x39   : > { %p1371_p2 = pnand %p1370_p1, %p1364_p9 }
  0x3b   : > { %1374 = shalt.err (!%p1371_p2)
}
  0x3c   : > { %1224 = dma.hbm_to_vmem [thread:$0]  (!%p1556_p11), %s1769_s2, 128, %s1560_s25, [#allocation6]  }
  0x3d   : > { %s1618_s4 = sadd.s32 1, %s1475_s15   ;;  %s27_s23 = sadd.s32 1, %s1471_s14 }
  0x3e   : > { %s24_s5 = ssub.s32 %s1475_s15, %s1618_s4  ;;  %p34_p13 = scmp.ne.s32.totalorder %s1471_s14, %s1467_s13 }
  0x3f   : > { %p25_p6 = scmp.eq.s32.totalorder %s24_s5, 0  ;;  %p35_p10 = scmp.eq.s32.totalorder %s1475_s15, 0 }
  0x40   : > { %p1778_p3 = scmp.eq.s32.totalorder %s1526_s16, 1  ;;  %p1235_p7 = scmp.lt.s32.totalorder %s1475_s15, 2 }
  0x41   : > { %s1634_s9 = scalar_select %p25_p6, %s1471_s14, %s27_s23  }
  0x42   : > { %p1628_p5 = por %p1778_p3, %p34_p13  ;;  %p36_p9 = por %p35_p10, %p34_p13 }
  0x43   : > { %s156_s10 = sand.u32 1, %s1471_s14   ;;  %s1039_s25 = sshll.u32 %s1475_s15, 8 }
  0x44   : > { %s1779_s6 = scalar_select %p1628_p5, 1, 0 }
  0x45   : > { %s980_s11 = sshll.u32 %s156_s10, 4  ;;  %s1641_s24 = scalar_lea.hbm %s1767_s0, %s1039_s25 }
  0x46   : > { %s160_s26 = scalar_lea.vmem [#allocation2], %s980_s11  ;;  %p1645_p11 = pnand %p1235_p7, %p36_p9 }
  0x47   : > { %s167_s27 = sshll.u32 %s160_s26, 4  ;;  %s1649_s22 = scalar_lea.sflag [#allocation3], %s156_s10  ;;  %s1643_s27 = int_to_ptr.vmem [resolvable:$true] %s167_s27 }
  0x48   : > { %s1375_s29 = scalar_lea.hbm %s1641_s24, 256  ;;  %p1377_p0 = pneg %p1645_p11 }
  0x49   : > { %p1376_p12 = scmp.ne.s32.totalorder %s1641_s24, %s1375_s29  ;;  %s1380_s5 = scalar_lea.hbm %s1767_s0, 512 }
  0x4a   : > { %p1381_p13 = scmp.lt.u32.totalorder %s1641_s24, %s1767_s0  ;;  %p1382_p6 = scmp.lt.u32.totalorder %s1380_s5, %s1375_s29 }
  0x4b   : > { %p1378_p1 = pnand %p1377_p0, %p1376_p12  ;;  %p1384_p3 = scmp.lt.u32.totalorder %s1375_s29, %s1641_s24 }
  0x4c   : > { %p1383_p10 = por %p1382_p6, %p1381_p13 }
  0x4d   : > { %p1379_p2 = pneg %p1378_p1 }
  0x4e   : > { %p1385_p7 = por %p1384_p3, %p1383_p10 }
  0x50   : > { %p1386_p9 = pnand %p1385_p7, %p1379_p2 }
  0x52   : > { %1389 = shalt.err (!%p1386_p9)
}
  0x53   : > { %s1390_s10 = scalar_lea.vmem %s1643_s27, 256  ;;  %s1481_s17 = smov [#allocation2]  }
  0x54   : > { %p1391_p12 = scmp.ne.s32.totalorder %s1643_s27, %s1390_s10  ;;  %s1395_s21 = sshll.u32 %s1481_s17, 4  ;;  %s1396_s21 = int_to_ptr.vmem [resolvable:$false] %s1395_s21 }
  0x55   : > { %s1397_s26 = scalar_lea.vmem %s1396_s21, 512  ;;  %p1398_p4 = scmp.lt.s32.totalorder %s1643_s27, %s1396_s21 }
  0x56   : > { %p1393_p1 = pnand %p1391_p12, %p1377_p0  ;;  %p1399_p13 = scmp.lt.s32.totalorder %s1397_s26, %s1390_s10 }
  0x58   : > { %p1394_p5 = pneg %p1393_p1  ;;  %p1400_p6 = por %p1399_p13, %p1398_p4 }
  0x5a   : > { %p1401_p10 = pnand %p1400_p6, %p1394_p5 }
  0x5c   : > { %1404 = shalt.err (!%p1401_p10)
}
  0x5d   : > { %1228 = dma.hbm_to_vmem [thread:$0]  (!%p1645_p11), %s1641_s24, 256, %s1643_s27, %s1649_s22, %s1479_s7, %s1479_s7, %s1480_s8  }
  0x5e   : > { %179 = sbr.rel (%p1545_p8) target bundleno = 1260 (0x4ec), region = 32  ;;  %s1683_s29 = sand.u32 (!%p1545_p8), 1, %s1467_s13  }
  0x5f   : > { %s984_s30 = sshll.u32 (!%p1545_p8), %s1683_s29, 4  ;;  %s182_s23 = scalar_lea.sflag (!%p1545_p8), [#allocation3], %s1683_s29 }
  0x60   : > { %s1689_s28 = scalar_lea.vmem (!%p1545_p8), [#allocation2], %s984_s30  ;;  %p1781_p4 = scmp.ne.s32.totalorder (!%p1545_p8), %s1774_s18, 0 }
  0x65   : > { %1450 = dma.done.wait (%p1781_p4), %s182_s23, 256  }
  0x66   : > { %1452 = vsyncadd (%p1781_p4), %s182_s23, 4294967040  ;;  %p1782_p5 = scmp.eq.s32.totalorder %s1526_s16, 0 }
  0x68   : > { %1454 = dma.done.wait (%p1782_p5), [#allocation6], 5248   ;;  %p1783_p8 = pmov %p1782_p5 }
  0x69   : > { %v1277_v0 = vld [vmem:[#allocation5] sm:$0xff]   ;;  %v1278_v1 = vld [vmem:[#allocation5 + $0x8] sm:$0xff]   ;;  %v1279_v2 = vld [vmem:[#allocation5 + $0x10] sm:$0xff]   ;;  %v240_v24 = vlaneseq  ;;  %s215_s18 = scalar_lea.vmem [#allocation8], %s984_s30  ;;  %s1044_s7 = sshll.u32 %s1526_s16, 8 }
  0x6a   : > { %1456 = vsyncadd (%p1783_p8), [#allocation6], 4294962048  ;;  %1106 = vmatprep.subr.bf16.mxu0 %v1277_v0  ;;  %v1280_v3 = vld [vmem:[#allocation5 + $0x18] sm:$0xff]   ;;  %v1285_v4 = vld [vmem:[%s1689_s28] sm:$0xff]   ;;  %s883_s20 = sshll.u32 %s215_s18, 4  ;;  %s1723_s27 = scalar_lea.hbm %s1770_s3, %s1044_s7  ;;  %s1718_s20 = int_to_ptr.vmem [resolvable:$true] %s883_s20 }
  0x6b   : > { %1107 = vmatpush3.bf16.msra.mxu0 %v1277_v0  ;;  %1122 = vmatprep.mubr.bf16.mxu0 %v1285_v4  ;;  %v1287_v5 = vld [vmem:[#allocation5 + $0x40] sm:$0xff]   ;;  %v1288_v6 = vld [vmem:[#allocation5 + $0x48] sm:$0xff]   ;;  %v1289_v8 = vld [vmem:[#allocation5 + $0x50] sm:$0xff]   ;;  %v1701_v25 = vshrl.u32 %v240_v24, 7  ;;  %s870_s16 = scalar_lea.sflag [#allocation4], %s1683_s29  ;;  %s1405_s22 = scalar_lea.vmem %s1718_s20, 256 }
  0x6c   : > { %1108 = vmatprep.subr.bf16.mxu0 %v1278_v1  ;;  %v1281_v7 = vld [vmem:[#allocation5 + $0x20] sm:$0xff]   ;;  %1126 = vmatprep.subr.bf16.mxu1 %v1287_v5  ;;  %v1282_v9 = vld [vmem:[#allocation5 + $0x28] sm:$0xff]   ;;  %v1290_v10 = vld [vmem:[#allocation5 + $0x58] sm:$0xff]   ;;  %p1406_p11 = scmp.ne.s32.totalorder %s1718_s20, %s1405_s22  ;;  %p1784_p0 = scmp.ne.s32.totalorder %s1779_s6, 0 }
  0x6d   : > { %1127 = vmatpush3.bf16.msra.mxu1 %v1287_v5  ;;  %v1283_v11 = vld [vmem:[#allocation5 + $0x30] sm:$0xff]   ;;  %v1291_v12 = vld [vmem:[#allocation5 + $0x60] sm:$0xff]   ;;  %v1284_v13 = vld [vmem:[#allocation5 + $0x38] sm:$0xff]   ;;  %v242_v26 = vsub.s32 0, %v1701_v25  ;;  %v378_v51 = vsub.s32 1, %v1701_v25  ;;  %s1482_s5 = smov [#allocation8]  }
  0x6e   : > { %1128 = vmatprep.subr.bf16.mxu1 %v1288_v6  ;;  %v1292_v14 = vld [vmem:[#allocation5 + $0x68] sm:$0xff]   ;;  %v1293_v16 = vld [vmem:[#allocation5 + $0x70] sm:$0xff]   ;;  %v1294_v17 = vld [vmem:[#allocation5 + $0x78] sm:$0xff]   ;;  %p1407_p2 = pnand %p1406_p11, %p1784_p0  ;;  %s1409_s11 = sshll.u32 %s1482_s5, 4  ;;  %s1410_s11 = int_to_ptr.vmem [resolvable:$false] %s1409_s11 }
  0x6f   : > { %1109 = vmatpush3.bf16.msra.mxu0 %v1278_v1  ;;  %v1286_v15 = vld [vmem:[%s1689_s28 + $0x8] sm:$0xff]   ;;  %v1295_v18 = vld [vmem:[#allocation5 + $0x80] sm:$0xff]   ;;  %v1297_v20 = vld [vmem:[#allocation5 + $0x90] sm:$0xff]   ;;  %s1411_s25 = scalar_lea.vmem %s1410_s11, 512  ;;  %p1412_p7 = scmp.lt.s32.totalorder %s1718_s20, %s1410_s11 }
  0x70   : > { %1110 = vmatprep.subr.bf16.mxu0 %v1279_v2  ;;  %v1296_v19 = vld [vmem:[#allocation5 + $0x88] sm:$0xff]   ;;  %v1298_v21 = vld [vmem:[#allocation5 + $0x98] sm:$0xff]   ;;  %v1299_v22 = vld [vmem:[#allocation5 + $0xa0] sm:$0xff]   ;;  %p1408_p3 = pneg %p1407_p2  ;;  %p1413_p9 = scmp.lt.s32.totalorder %s1411_s25, %s1405_s22 }
  0x71   : > { %1129 = vmatpush3.bf16.msra.mxu1 %v1288_v6  ;;  %v1300_v23 = vld [vmem:[#allocation5 + $0xa8] sm:$0xff]   ;;  %v1704_v27 = vld [vmem:[#allocation7] sm:$0xff]  ;;  %v1301_v43 = vld [vmem:[#allocation5 + $0xb0] sm:$0xff]  }
  0x72   : > { %1130 = vmatprep.subr.bf16.mxu1 %v1289_v8  ;;  %v243_v28 = vrot.slane %v1704_v27, %v242_v26  ;;  %v1302_v44 = vld [vmem:[#allocation5 + $0xb8] sm:$0xff]   ;;  %v1303_v45 = vld [vmem:[#allocation5 + $0xc0] sm:$0xff]   ;;  %v1304_v46 = vld [vmem:[#allocation5 + $0xc8] sm:$0xff]   ;;  %v379_v52 = vrot.slane %v1704_v27, %v378_v51  ;;  %p1414_p12 = por %p1413_p9, %p1412_p7 }
  0x73   : > { %1111 = vmatpush3.bf16.msra.mxu0 %v1279_v2  ;;  %v1305_v47 = vld [vmem:[#allocation5 + $0xd0] sm:$0xff]   ;;  %v1306_v48 = vld [vmem:[#allocation5 + $0xd8] sm:$0xff]   ;;  %v1307_v49 = vld [vmem:[#allocation5 + $0xe0] sm:$0xff]  }
  0x74   : > { %1112 = vmatprep.subr.bf16.mxu0 %v1280_v3  ;;  %v1308_v50 = vld [vmem:[#allocation5 + $0xe8] sm:$0xff]   ;;  %v1310_v4 = vld [vmem:[#allocation5 + $0xf8] sm:$0xff]   ;;  %v1311_v5 = vld [vmem:[#allocation5 + $0x100] sm:$0xff]   ;;  %p1415_p1 = pnand %p1414_p12, %p1408_p3 }
  0x75   : > { %1131 = vmatpush3.bf16.msra.mxu1 %v1289_v8  ;;  %v1312_v6 = vld [vmem:[#allocation5 + $0x108] sm:$0xff]   ;;  %v1314_v8 = vld [vmem:[#allocation5 + $0x118] sm:$0xff]  }
  0x76   : > { %1132 = vmatprep.subr.bf16.mxu1 %v1290_v10 }
  0x77   : > { %1113 = vmatpush3.bf16.msra.mxu0 %v1280_v3  ;;  %v1309_v3 = vld [vmem:[#allocation5 + $0xf0] sm:$0xff]  }
  0x78   : > { %1114 = vmatprep.subr.bf16.mxu0 %v1281_v7 }
  0x79   : > { %1133 = vmatpush3.bf16.msra.mxu1 %v1290_v10  ;;  %v1316_v10 = vld [vmem:[#allocation5 + $0x128] sm:$0xff]  }
  0x7a   : > { %1134 = vmatprep.subr.bf16.mxu1 %v1291_v12 }
  0x7b   : > { %1115 = vmatpush3.bf16.msra.mxu0 %v1281_v7  ;;  %v1313_v7 = vld [vmem:[#allocation5 + $0x110] sm:$0xff]  }
  0x7c   : > { %1116 = vmatprep.subr.bf16.mxu0 %v1282_v9 }
  0x7d   : > { %1135 = vmatpush3.bf16.msra.mxu1 %v1291_v12 }
  0x7e   : > { %1136 = vmatprep.subr.bf16.mxu1 %v1292_v14 }
  0x7f   : > { %1117 = vmatpush3.bf16.msra.mxu0 %v1282_v9  ;;  %v1315_v9 = vld [vmem:[#allocation5 + $0x120] sm:$0xff]  }
  0x80   : > { %1118 = vmatprep.subr.bf16.mxu0 %v1283_v11 }
  0x81   : > { %1137 = vmatpush3.bf16.msra.mxu1 %v1292_v14 }
  0x82   : > { %1138 = vmatprep.subr.bf16.mxu1 %v1293_v16 }
  0x83   : > { %1119 = vmatpush3.bf16.msra.mxu0 %v1283_v11  ;;  %v502_v11 = vsub.s32 2, %v1701_v25 }
  0x84   : > { %1120 = vmatprep.subr.bf16.mxu0 %v1284_v13 }
  0x85   : > { %1139 = vmatpush3.bf16.msra.mxu1 %v1293_v16  ;;  %v503_v12 = vrot.slane %v1704_v27, %v502_v11 }
  0x86   : > { %1140 = vmatprep.subr.bf16.mxu1 %v1294_v17 }
  0x87   : > { %1121 = vmatpush3.bf16.msra.mxu0 %v1284_v13 }
  0x88   : > { %1146 = vmatprep.subr.bf16.mxu0 %v1295_v18 }
  0x89   : > { %1141 = vmatpush3.bf16.msra.mxu1 %v1294_v17 }
  0x8a   : > { %1123 = vmatmul.mubr.bf16.vlgmr.msra.gmra.mrb[0].mxu0 %v1286_v15  ;;  %1166 = vmatprep.subr.bf16.mxu1 %v1303_v45 }
  0x8b   : > { %1147 = vmatpush3.bf16.msra.mxu0 %v1295_v18 }
  0x8c   : > { %1148 = vmatprep.subr.bf16.mxu0 %v1296_v19 }
  0x8f   : > { %1149 = vmatpush3.bf16.msra.mxu0 %v1296_v19 }
  0x90   : > { %1150 = vmatprep.subr.bf16.mxu0 %v1297_v20 }
  0x93   : > { %1151 = vmatpush3.bf16.msra.mxu0 %v1297_v20 }
  0x94   : > { %1152 = vmatprep.subr.bf16.mxu0 %v1298_v21 }
  0x97   : > { %1153 = vmatpush3.bf16.msra.mxu0 %v1298_v21 }
  0x98   : > { %1154 = vmatprep.subr.bf16.mxu0 %v1299_v22 }
  0x9b   : > { %1155 = vmatpush3.bf16.msra.mxu0 %v1299_v22 }
  0x9c   : > { %1156 = vmatprep.subr.bf16.mxu0 %v1300_v23 }
  0x9f   : > { %1157 = vmatpush3.bf16.msra.mxu0 %v1300_v23 }
  0xa0   : > { %1158 = vmatprep.subr.bf16.mxu0 %v1301_v43 }
  0xa3   : > { %1159 = vmatpush3.bf16.msra.mxu0 %v1301_v43 }
  0xa4   : > { %1160 = vmatprep.subr.bf16.mxu0 %v1302_v44 }
  0xa7   : > { %1161 = vmatpush3.bf16.msra.mxu0 %v1302_v44 }
  0xa8   : > { %1186 = vmatprep.subr.bf16.mxu0 %v1311_v5 }
 0x15d   : > { %v1124_v29 = vpop.f32.mrb[0].mxu0 }
 0x15e   : > { %v347_v30 = vadd.f32 %v1124_v29, %v243_v28  ;;  %v338_v31 = vpop.f32.mrb[1].mxu0  ;;  %v1317_v29 = vld [vmem:[#allocation5 + $0x130] sm:$0xff]  }
 0x15f   : > { %v339_v32 = vadd.f32 %v338_v31, %v243_v28  ;;  %v1125_v33 = vpop.f32.mrb[2].mxu0  ;;  %v626_v31 = vsub.s32 3, %v1701_v25 }
 0x160   : > { %v350_v34 = vadd.f32 %v1125_v33, %v243_v28  ;;  %v341_v35 = vpop.f32.mrb[3].mxu0  ;;  %v355_v37 = vmax.f32 %v347_v30, 0.0  ;;  %v1318_v30 = vld [vmem:[#allocation5 + $0x138] sm:$0xff]  }
 0x161   : > { %v342_v36 = vadd.f32 %v341_v35, %v243_v28  ;;  %v353_v39 = vmax.f32 %v339_v32, 0.0  ;;  %v627_v32 = vrot.slane %v1704_v27, %v626_v31 }
 0x162   : > { %v356_v38 = vmax.f32 %v350_v34, 0.0 }
 0x163   : > { %v354_v40 = vmax.f32 %v342_v36, 0.0 }
 0x164   : > { %v358_v41 = vpack.c.bf16 %v356_v38, %v355_v37 }
 0x165   : > { %v357_v42 = vpack.c.bf16 %v354_v40, %v353_v39 }
 0x167   : > { %1142 = vmatprep.mubr.bf16.mxu1 %v357_v42 }
 0x168   : > { %1143 = vmatmul.mubr.bf16.vlgmr.msra.gmra.mrb[0].mxu1 %v358_v41 }
 0x169   : > { %1167 = vmatpush3.bf16.msra.mxu1 %v1303_v45 }
 0x16a   : > { %1168 = vmatprep.subr.bf16.mxu1 %v1304_v46 }
 0x16d   : > { %1169 = vmatpush3.bf16.msra.mxu1 %v1304_v46 }
 0x16e   : > { %1170 = vmatprep.subr.bf16.mxu1 %v1305_v47 }
 0x171   : > { %1171 = vmatpush3.bf16.msra.mxu1 %v1305_v47  ;;  %v750_v47 = vsub.s32 4, %v1701_v25 }
 0x172   : > { %1172 = vmatprep.subr.bf16.mxu1 %v1306_v48 }
 0x175   : > { %1173 = vmatpush3.bf16.msra.mxu1 %v1306_v48  ;;  %v751_v48 = vrot.slane %v1704_v27, %v750_v47 }
 0x176   : > { %1174 = vmatprep.subr.bf16.mxu1 %v1307_v49 }
 0x179   : > { %1175 = vmatpush3.bf16.msra.mxu1 %v1307_v49 }
 0x17a   : > { %1176 = vmatprep.subr.bf16.mxu1 %v1308_v50 }
 0x17d   : > { %1177 = vmatpush3.bf16.msra.mxu1 %v1308_v50 }
 0x17e   : > { %1178 = vmatprep.subr.bf16.mxu1 %v1309_v3 }
 0x181   : > { %1179 = vmatpush3.bf16.msra.mxu1 %v1309_v3 }
 0x182   : > { %1180 = vmatprep.subr.bf16.mxu1 %v1310_v4 }
 0x185   : > { %1181 = vmatpush3.bf16.msra.mxu1 %v1310_v4 }
 0x23b   : > { %v1144_v53 = vpop.f32.mrb[0].mxu1 }
 0x23c   : > { %v471_v54 = vadd.f32 %v1144_v53, %v379_v52  ;;  %v462_v55 = vpop.f32.mrb[1].mxu1 }
 0x23d   : > { %v463_v56 = vadd.f32 %v462_v55, %v379_v52  ;;  %v1145_v57 = vpop.f32.mrb[2].mxu1 }
 0x23e   : > { %v474_v58 = vadd.f32 %v1145_v57, %v379_v52  ;;  %v465_v59 = vpop.f32.mrb[3].mxu1  ;;  %v479_v61 = vmax.f32 %v471_v54, 0.0 }
 0x23f   : > { %v466_v60 = vadd.f32 %v465_v59, %v379_v52  ;;  %v477_v63 = vmax.f32 %v463_v56, 0.0 }
 0x240   : > { %v480_v62 = vmax.f32 %v474_v58, 0.0 }
 0x241   : > { %v478_v0 = vmax.f32 %v466_v60, 0.0 }
 0x242   : > { %v482_v1 = vpack.c.bf16 %v480_v62, %v479_v61 }
 0x243   : > { %v481_v2 = vpack.c.bf16 %v478_v0, %v477_v63 }
 0x245   : > { %1162 = vmatprep.mubr.bf16.mxu0 %v481_v2 }
 0x246   : > { %1163 = vmatmul.mubr.bf16.vlgmr.msra.gmra.mrb[4].mxu0 %v482_v1 }
 0x247   : > { %1187 = vmatpush3.bf16.msra.mxu0 %v1311_v5 }
 0x248   : > { %1188 = vmatprep.subr.bf16.mxu0 %v1312_v6 }
 0x24b   : > { %1189 = vmatpush3.bf16.msra.mxu0 %v1312_v6 }
 0x24c   : > { %1190 = vmatprep.subr.bf16.mxu0 %v1313_v7 }
 0x24f   : > { %1191 = vmatpush3.bf16.msra.mxu0 %v1313_v7 }
 0x250   : > { %1192 = vmatprep.subr.bf16.mxu0 %v1314_v8 }
 0x253   : > { %1193 = vmatpush3.bf16.msra.mxu0 %v1314_v8 }
 0x254   : > { %1194 = vmatprep.subr.bf16.mxu0 %v1315_v9 }
 0x257   : > { %1195 = vmatpush3.bf16.msra.mxu0 %v1315_v9 }
 0x258   : > { %1196 = vmatprep.subr.bf16.mxu0 %v1316_v10 }
 0x25b   : > { %1197 = vmatpush3.bf16.msra.mxu0 %v1316_v10 }
 0x25c   : > { %1198 = vmatprep.subr.bf16.mxu0 %v1317_v29 }
 0x25f   : > { %1199 = vmatpush3.bf16.msra.mxu0 %v1317_v29 }
 0x260   : > { %1200 = vmatprep.subr.bf16.mxu0 %v1318_v30 }
 0x263   : > { %1201 = vmatpush3.bf16.msra.mxu0 %v1318_v30 }
 0x319   : > { %v1164_v13 = vpop.f32.mrb[4].mxu0 }
 0x31a   : > { %v595_v14 = vadd.f32 %v1164_v13, %v503_v12  ;;  %v586_v15 = vpop.f32.mrb[5].mxu0 }
 0x31b   : > { %v587_v16 = vadd.f32 %v586_v15, %v503_v12  ;;  %v1165_v17 = vpop.f32.mrb[6].mxu0 }
 0x31c   : > { %v598_v18 = vadd.f32 %v1165_v17, %v503_v12  ;;  %v589_v19 = vpop.f32.mrb[7].mxu0  ;;  %v603_v21 = vmax.f32 %v595_v14, 0.0 }
 0x31d   : > { %v590_v20 = vadd.f32 %v589_v19, %v503_v12  ;;  %v601_v23 = vmax.f32 %v587_v16, 0.0 }
 0x31e   : > { %v604_v22 = vmax.f32 %v598_v18, 0.0 }
 0x31f   : > { %v602_v24 = vmax.f32 %v590_v20, 0.0 }
 0x320   : > { %v606_v26 = vpack.c.bf16 %v604_v22, %v603_v21 }
 0x321   : > { %v605_v28 = vpack.c.bf16 %v602_v24, %v601_v23 }
 0x323   : > { %1182 = vmatprep.mubr.bf16.mxu1 %v605_v28 }
 0x324   : > { %1183 = vmatmul.mubr.bf16.vlgmr.msra.gmra.mrb[4].mxu1 %v606_v26 }
 0x3f7   : > { %v1184_v33 = vpop.f32.mrb[4].mxu1 }
 0x3f8   : > { %v719_v34 = vadd.f32 %v1184_v33, %v627_v32  ;;  %v710_v35 = vpop.f32.mrb[5].mxu1 }
 0x3f9   : > { %v711_v36 = vadd.f32 %v710_v35, %v627_v32  ;;  %v1185_v37 = vpop.f32.mrb[6].mxu1 }
 0x3fa   : > { %v722_v38 = vadd.f32 %v1185_v37, %v627_v32  ;;  %v713_v39 = vpop.f32.mrb[7].mxu1  ;;  %v727_v41 = vmax.f32 %v719_v34, 0.0 }
 0x3fb   : > { %v714_v40 = vadd.f32 %v713_v39, %v627_v32  ;;  %v725_v43 = vmax.f32 %v711_v36, 0.0 }
 0x3fc   : > { %v728_v42 = vmax.f32 %v722_v38, 0.0 }
 0x3fd   : > { %v726_v44 = vmax.f32 %v714_v40, 0.0 }
 0x3fe   : > { %v730_v45 = vpack.c.bf16 %v728_v42, %v727_v41 }
 0x3ff   : > { %v729_v46 = vpack.c.bf16 %v726_v44, %v725_v43 }
 0x401   : > { %1202 = vmatprep.mubr.bf16.mxu0 %v729_v46 }
 0x402   : > { %1203 = vmatmul.mubr.bf16.vlgmr.msra.gmra.mrb[8].mxu0 %v730_v45 }
 0x4d5   : > { %v1204_v49 = vpop.f32.mrb[8].mxu0 }
 0x4d6   : > { %v834_v50 = vpop.f32.mrb[9].mxu0  ;;  %v843_v52 = vadd.f32 %v1204_v49, %v751_v48 }
 0x4d7   : > { %v1205_v51 = vpop.f32.mrb[10].mxu0  ;;  %v835_v55 = vadd.f32 %v834_v50, %v751_v48 }
 0x4d8   : > { %v846_v53 = vadd.f32 %v1205_v51, %v751_v48  ;;  %v837_v54 = vpop.f32.mrb[11].mxu0 }
 0x4d9   : > { %v838_v25 = vadd.f32 %v837_v54, %v751_v48 }
 0x4da   : > { %v1053_v27 = vpack.c.bf16 %v846_v53, %v843_v52 }
 0x4db   : > { %v1048_v56 = vpack.c.bf16 %v838_v25, %v835_v55 }
 0x4dc   : > { %1055 = vst [vmem:[%s215_s18 + $0x8] sm:$0xff] %v1053_v27  }
 0x4dd   : > { %1049 = vst [vmem:[%s215_s18] sm:$0xff] %v1048_v56  }
 0x4de   : > { %1418 = shalt.err (!%p1415_p1)
}
 0x4df   : > { %s1419_s10 = scalar_lea.hbm %s1723_s27, 256  ;;  %s1423_s26 = scalar_lea.hbm %s1770_s3, 512 }
 0x4e0   : > { %p1420_p13 = scmp.ne.s32.totalorder %s1723_s27, %s1419_s10  ;;  %p1424_p4 = scmp.lt.u32.totalorder %s1723_s27, %s1770_s3 }
 0x4e1   : > { %p1425_p5 = scmp.lt.u32.totalorder %s1423_s26, %s1419_s10  ;;  %p1427_p11 = scmp.lt.u32.totalorder %s1419_s10, %s1723_s27 }
 0x4e2   : > { %p1421_p6 = pnand %p1420_p13, %p1784_p0 }
 0x4e3   : > { %p1426_p8 = por %p1425_p5, %p1424_p4 }
 0x4e4   : > { %p1422_p10 = pneg %p1421_p6 }
 0x4e5   : > { %p1428_p2 = por %p1427_p11, %p1426_p8 }
 0x4e7   : > { %p1429_p3 = pnand %p1428_p2, %p1422_p10 }
 0x4e9   : > { %1432 = shalt.err (!%p1429_p3)
}
 0x4ea   : > { %s1483_s28 = smov 64   ;;  %s1484_s18 = smov 4  }
 0x4eb   : > { %1216 = dma.vmem_to_hbm [thread:$0]  (%p1784_p0), %s1718_s20, 256, %s1723_s27, %s870_s16, %s1483_s28, %s1483_s28, %s1484_s18  }
 0x4ec PF: > { %s898_s7 = sand.u32 1, %s1463_s12   ;;  %p1785_p7 = scmp.ne.s32.totalorder %s1775_s19, 0 }
 0x4ed   : > { %p1786_p9 = scmp.ge.s32.totalorder %s1475_s15, 2  ;;  %s899_s8 = scalar_lea.sflag [#allocation4], %s898_s7 }
 0x4ef   : > { %p1230_p12 = pnand %p1786_p9, %p1785_p7 }
 0x4f1   : > { %1458 = dma.done.wait (!%p1230_p12), %s899_s8, 256  }
 0x4f2   : > { %1460 = vsyncadd (!%p1230_p12), %s899_s8, 4294967040  ;;  %p17_p1 = scmp.ge.s32.totalorder %s1618_s4, 4   ;;  %s1787_s12 = smov %s1467_s13 }
 0x4f3   : > { %s1788_s13 = smov %s1471_s14  ;;  %s1789_s14 = smov %s1634_s9 }
 0x4f4   : > { %s1790_s15 = smov %s1618_s4  ;;  %19 = sbr.rel (!%p17_p1) target bundleno = 6 (0x6), region = 89 }
 0x4fb   :  { %904 = vsyncpa [#allocation3], 1 }
 0x4fc   :  { %906 = vsyncpa [#allocation3 + $0x1], 1 }
 0x4fd   :  { %907 = vsyncpa [#allocation6], 1 }
 0x4fe   :  { %908 = vsyncpa [#allocation4], 1 }
 0x4ff   :  { %910 = vsyncpa [#allocation4 + $0x1], 1 }

// kernel: tpu_custom_call.1
= control target key start
LH: loop header
LB: loop body
LE: loop exit
PB: predicated region body
PF: predicated region fallthrough
CT: control target
= control target key end

     0   :  { %8 = vsyncpa [#allocation3], 0  ;;  %s1767_s0 = inlined_call_operand.hbm [shape: bf16[64,128], index: 0, kind: input, shape index: {}]   ;;  %s1768_s1 = inlined_call_operand.hbm [shape: bf16[5,128,128], index: 1, kind: input, shape index: {}]   ;;  %s1769_s2 = inlined_call_operand.hbm [shape: f32[8,128], index: 2, kind: input, shape index: {}]   ;;  %s1770_s3 = inlined_call_operand.hbm [shape: bf16[64,128], index: 3, kind: output, shape index: {}]  }
   0x1   :  { %10 = vsyncpa [#allocation3 + $0x1], 0 }
   0x2   :  { %11 = vsyncpa [#allocation6], 0 }
   0x3   :  { %12 = vsyncpa [#allocation4], 0 }
   0x4   :  { %14 = vsyncpa [#allocation4 + $0x1], 0  ;;  %s1505_s12 = smov 0   ;;  %s1507_s13 = smov 0  }
   0x5   :  { %s1509_s14 = smov 0   ;;  %s1511_s15 = smov 0  }
   0x6 LB: > { %s1526_s16 = sadd.s32 4294967295, %s1475_s15   ;;  %s975_s17 = sadd.s32 4294967294, %s1475_s15   ;;  %s1475_s15 = sphi %s1511_s15, %s1790_s15   ;;  %s1471_s14 = sphi %s1509_s14, %s1789_s14   ;;  %s1467_s13 = sphi %s1507_s13, %s1788_s13   ;;  %s1463_s12 = sphi %s1505_s12, %s1787_s12  }
   0x7   : > { %p40_p0 = scmp.ne.s32.totalorder %s1467_s13, %s1463_s12  ;;  %p1771_p1 = scmp.eq.s32.totalorder %s1526_s16, 0 }
   0x8   : > { %p112_p3 = scmp.eq.s32.totalorder %s975_s17, 1  ;;  %p976_p5 = scmp.ge.s32.totalorder %s1475_s15, 1 }
   0x9   : > { %p1535_p4 = por %p1771_p1, %p40_p0  ;;  %p119_p7 = scmp.lt.s32.totalorder %s1475_s15, 3 }
   0xa   : > { %p1540_p6 = por %p112_p3, %p40_p0  ;;  %s1477_s21 = smov [#allocation5]  }
   0xb   : > { %s1774_s18 = scalar_select %p1535_p4, 1, 0 }
   0xc   : > { %s1775_s19 = scalar_select %p1540_p6, 1, 0 }
   0xd   : > { %p1545_p8 = pnand %p976_p5, %p119_p7  ;;  %s131_s22 = sshll.u32 %s1477_s21, 4  ;;  %s1549_s22 = int_to_ptr.vmem [resolvable:$true] %s131_s22 }
   0xe   : > { %s1478_s24 = smov [#allocation7]   ;;  %s1319_s28 = scalar_lea.hbm %s1768_s1, 5120 }
   0xf   : > { %p1218_p9 = pneg %p1545_p8  ;;  %s145_s25 = sshll.u32 %s1478_s24, 4  ;;  %s1560_s25 = int_to_ptr.vmem [resolvable:$true] %s145_s25 }
  0x10   : > { %p1320_p12 = scmp.ne.s32.totalorder %s1768_s1, %s1319_s28  ;;  %p1326_p5 = scmp.lt.u32.totalorder %s1319_s28, %s1768_s1 }
  0x11   : > { %p1556_p11 = pnand %p1218_p9, %p1771_p1 }
  0x13   : > { %p1321_p13 = pneg %p1556_p11 }
  0x15   : > { %p1322_p0 = pnand %p1321_p13, %p1320_p12 }
  0x17   : > { %p1323_p3 = pneg %p1322_p0 }
  0x19   : > { %p1328_p7 = pnand %p1326_p5, %p1323_p3 }
  0x1b   : > { %1331 = shalt.err (!%p1328_p7)
}
  0x1c   : > { %s1332_s6 = scalar_lea.vmem %s1549_s22, 5120  ;;  %p1340_p2 = scmp.lt.s32.totalorder %s1549_s22, %s1549_s22 }
  0x1d   : > { %p1333_p9 = scmp.ne.s32.totalorder %s1549_s22, %s1332_s6  ;;  %p1341_p12 = scmp.lt.s32.totalorder %s1332_s6, %s1332_s6 }
  0x1f   : > { %p1335_p10 = pnand %p1333_p9, %p1321_p13  ;;  %p1342_p0 = por %p1341_p12, %p1340_p2 }
  0x21   : > { %p1336_p1 = pneg %p1335_p10 }
  0x23   : > { %p1343_p6 = pnand %p1342_p0, %p1336_p1 }
  0x25   : > { %1346 = shalt.err (!%p1343_p6)
}
  0x26   : > { %s1479_s7 = smov 64   ;;  %s1480_s8 = smov 4  }
  0x27   : > { %1221 = dma.hbm_to_vmem [thread:$0]  (!%p1556_p11), %s1768_s1, 5120, %s1549_s22, [#allocation6], %s1479_s7, %s1479_s7, %s1480_s8  }
  0x28   : > { %s1347_s21 = scalar_lea.hbm %s1769_s2, 128 }
  0x29   : > { %p1348_p1 = scmp.ne.s32.totalorder %s1769_s2, %s1347_s21  ;;  %p1354_p10 = scmp.lt.u32.totalorder %s1347_s21, %s1769_s2 }
  0x2b   : > { %p1350_p2 = pnand %p1348_p1, %p1321_p13 }
  0x2d   : > { %p1351_p6 = pneg %p1350_p2 }
  0x2f   : > { %p1356_p3 = pnand %p1354_p10, %p1351_p6 }
  0x31   : > { %1359 = shalt.err (!%p1356_p3)
}
  0x32   : > { %s1360_s22 = scalar_lea.vmem %s1560_s25, 128  ;;  %p1368_p12 = scmp.lt.s32.totalorder %s1560_s25, %s1560_s25 }
  0x33   : > { %p1361_p5 = scmp.ne.s32.totalorder %s1560_s25, %s1360_s22  ;;  %p1369_p0 = scmp.lt.s32.totalorder %s1360_s22, %s1360_s22 }
  0x35   : > { %p1363_p7 = pnand %p1361_p5, %p1321_p13  ;;  %p1370_p1 = por %p1369_p0, %p1368_p12 }
  0x37   : > { %p1364_p9 = pneg %p1363_p7 }
  0x39   : > { %p1371_p2 = pnand %p1370_p1, %p1364_p9 }
  0x3b   : > { %1374 = shalt.err (!%p1371_p2)
}
  0x3c   : > { %1224 = dma.hbm_to_vmem [thread:$0]  (!%p1556_p11), %s1769_s2, 128, %s1560_s25, [#allocation6]  }
  0x3d   : > { %s1618_s4 = sadd.s32 1, %s1475_s15   ;;  %s27_s23 = sadd.s32 1, %s1471_s14 }
  0x3e   : > { %s24_s5 = ssub.s32 %s1475_s15, %s1618_s4  ;;  %p34_p13 = scmp.ne.s32.totalorder %s1471_s14, %s1467_s13 }
  0x3f   : > { %p25_p6 = scmp.eq.s32.totalorder %s24_s5, 0  ;;  %p35_p10 = scmp.eq.s32.totalorder %s1475_s15, 0 }
  0x40   : > { %p1778_p3 = scmp.eq.s32.totalorder %s1526_s16, 1  ;;  %p1235_p7 = scmp.lt.s32.totalorder %s1475_s15, 2 }
  0x41   : > { %s1634_s9 = scalar_select %p25_p6, %s1471_s14, %s27_s23  }
  0x42   : > { %p1628_p5 = por %p1778_p3, %p34_p13  ;;  %p36_p9 = por %p35_p10, %p34_p13 }
  0x43   : > { %s156_s10 = sand.u32 1, %s1471_s14   ;;  %s1039_s25 = sshll.u32 %s1475_s15, 8 }
  0x44   : > { %s1779_s6 = scalar_select %p1628_p5, 1, 0 }
  0x45   : > { %s980_s11 = sshll.u32 %s156_s10, 4  ;;  %s1641_s24 = scalar_lea.hbm %s1767_s0, %s1039_s25 }
  0x46   : > { %s160_s26 = scalar_lea.vmem [#allocation2], %s980_s11  ;;  %p1645_p11 = pnand %p1235_p7, %p36_p9 }
  0x47   : > { %s167_s27 = sshll.u32 %s160_s26, 4  ;;  %s1649_s22 = scalar_lea.sflag [#allocation3], %s156_s10  ;;  %s1643_s27 = int_to_ptr.vmem [resolvable:$true] %s167_s27 }
  0x48   : > { %s1375_s29 = scalar_lea.hbm %s1641_s24, 256  ;;  %p1377_p0 = pneg %p1645_p11 }
  0x49   : > { %p1376_p12 = scmp.ne.s32.totalorder %s1641_s24, %s1375_s29  ;;  %s1380_s5 = scalar_lea.hbm %s1767_s0, 512 }
  0x4a   : > { %p1381_p13 = scmp.lt.u32.totalorder %s1641_s24, %s1767_s0  ;;  %p1382_p6 = scmp.lt.u32.totalorder %s1380_s5, %s1375_s29 }
  0x4b   : > { %p1378_p1 = pnand %p1377_p0, %p1376_p12  ;;  %p1384_p3 = scmp.lt.u32.totalorder %s1375_s29, %s1641_s24 }
  0x4c   : > { %p1383_p10 = por %p1382_p6, %p1381_p13 }
  0x4d   : > { %p1379_p2 = pneg %p1378_p1 }
  0x4e   : > { %p1385_p7 = por %p1384_p3, %p1383_p10 }
  0x50   : > { %p1386_p9 = pnand %p1385_p7, %p1379_p2 }
  0x52   : > { %1389 = shalt.err (!%p1386_p9)
}
  0x53   : > { %s1390_s10 = scalar_lea.vmem %s1643_s27, 256  ;;  %s1481_s17 = smov [#allocation2]  }
  0x54   : > { %p1391_p12 = scmp.ne.s32.totalorder %s1643_s27, %s1390_s10  ;;  %s1395_s21 = sshll.u32 %s1481_s17, 4  ;;  %s1396_s21 = int_to_ptr.vmem [resolvable:$false] %s1395_s21 }
  0x55   : > { %s1397_s26 = scalar_lea.vmem %s1396_s21, 512  ;;  %p1398_p4 = scmp.lt.s32.totalorder %s1643_s27, %s1396_s21 }
  0x56   : > { %p1393_p1 = pnand %p1391_p12, %p1377_p0  ;;  %p1399_p13 = scmp.lt.s32.totalorder %s1397_s26, %s1390_s10 }
  0x58   : > { %p1394_p5 = pneg %p1393_p1  ;;  %p1400_p6 = por %p1399_p13, %p1398_p4 }
  0x5a   : > { %p1401_p10 = pnand %p1400_p6, %p1394_p5 }
  0x5c   : > { %1404 = shalt.err (!%p1401_p10)
}
  0x5d   : > { %1228 = dma.hbm_to_vmem [thread:$0]  (!%p1645_p11), %s1641_s24, 256, %s1643_s27, %s1649_s22, %s1479_s7, %s1479_s7, %s1480_s8  }
  0x5e   : > { %179 = sbr.rel (%p1545_p8) target bundleno = 1260 (0x4ec), region = 32  ;;  %s1683_s29 = sand.u32 (!%p1545_p8), 1, %s1467_s13  }
  0x5f   : > { %s984_s30 = sshll.u32 (!%p1545_p8), %s1683_s29, 4  ;;  %s182_s23 = scalar_lea.sflag (!%p1545_p8), [#allocation3], %s1683_s29 }
  0x60   : > { %s1689_s28 = scalar_lea.vmem (!%p1545_p8), [#allocation2], %s984_s30  ;;  %p1781_p4 = scmp.ne.s32.totalorder (!%p1545_p8), %s1774_s18, 0 }
  0x65   : > { %1450 = dma.done.wait (%p1781_p4), %s182_s23, 256  }
  0x66   : > { %1452 = vsyncadd (%p1781_p4), %s182_s23, 4294967040  ;;  %p1782_p5 = scmp.eq.s32.totalorder %s1526_s16, 0 }
  0x68   : > { %1454 = dma.done.wait (%p1782_p5), [#allocation6], 5248   ;;  %p1783_p8 = pmov %p1782_p5 }
  0x69   : > { %v1277_v0 = vld [vmem:[#allocation5] sm:$0xff]   ;;  %v1278_v1 = vld [vmem:[#allocation5 + $0x8] sm:$0xff]   ;;  %v1279_v2 = vld [vmem:[#allocation5 + $0x10] sm:$0xff]   ;;  %v240_v24 = vlaneseq  ;;  %s215_s18 = scalar_lea.vmem [#allocation8], %s984_s30  ;;  %s1044_s7 = sshll.u32 %s1526_s16, 8 }
  0x6a   : > { %1456 = vsyncadd (%p1783_p8), [#allocation6], 4294962048  ;;  %1106 = vmatprep.subr.bf16.mxu0 %v1277_v0  ;;  %v1280_v3 = vld [vmem:[#allocation5 + $0x18] sm:$0xff]   ;;  %v1285_v4 = vld [vmem:[%s1689_s28] sm:$0xff]   ;;  %s883_s20 = sshll.u32 %s215_s18, 4  ;;  %s1723_s27 = scalar_lea.hbm %s1770_s3, %s1044_s7  ;;  %s1718_s20 = int_to_ptr.vmem [resolvable:$true] %s883_s20 }
  0x6b   : > { %1107 = vmatpush3.bf16.msra.mxu0 %v1277_v0  ;;  %1122 = vmatprep.mubr.bf16.mxu0 %v1285_v4  ;;  %v1287_v5 = vld [vmem:[#allocation5 + $0x40] sm:$0xff]   ;;  %v1288_v6 = vld [vmem:[#allocation5 + $0x48] sm:$0xff]   ;;  %v1289_v8 = vld [vmem:[#allocation5 + $0x50] sm:$0xff]   ;;  %v1701_v25 = vshrl.u32 %v240_v24, 7  ;;  %s870_s16 = scalar_lea.sflag [#allocation4], %s1683_s29  ;;  %s1405_s22 = scalar_lea.vmem %s1718_s20, 256 }
  0x6c   : > { %1108 = vmatprep.subr.bf16.mxu0 %v1278_v1  ;;  %v1281_v7 = vld [vmem:[#allocation5 + $0x20] sm:$0xff]   ;;  %1126 = vmatprep.subr.bf16.mxu1 %v1287_v5  ;;  %v1282_v9 = vld [vmem:[#allocation5 + $0x28] sm:$0xff]   ;;  %v1290_v10 = vld [vmem:[#allocation5 + $0x58] sm:$0xff]   ;;  %p1406_p11 = scmp.ne.s32.totalorder %s1718_s20, %s1405_s22  ;;  %p1784_p0 = scmp.ne.s32.totalorder %s1779_s6, 0 }
  0x6d   : > { %1127 = vmatpush3.bf16.msra.mxu1 %v1287_v5  ;;  %v1283_v11 = vld [vmem:[#allocation5 + $0x30] sm:$0xff]   ;;  %v1291_v12 = vld [vmem:[#allocation5 + $0x60] sm:$0xff]   ;;  %v1284_v13 = vld [vmem:[#allocation5 + $0x38] sm:$0xff]   ;;  %v242_v26 = vsub.s32 0, %v1701_v25  ;;  %v378_v51 = vsub.s32 1, %v1701_v25  ;;  %s1482_s5 = smov [#allocation8]  }
  0x6e   : > { %1128 = vmatprep.subr.bf16.mxu1 %v1288_v6  ;;  %v1292_v14 = vld [vmem:[#allocation5 + $0x68] sm:$0xff]   ;;  %v1293_v16 = vld [vmem:[#allocation5 + $0x70] sm:$0xff]   ;;  %v1294_v17 = vld [vmem:[#allocation5 + $0x78] sm:$0xff]   ;;  %p1407_p2 = pnand %p1406_p11, %p1784_p0  ;;  %s1409_s11 = sshll.u32 %s1482_s5, 4  ;;  %s1410_s11 = int_to_ptr.vmem [resolvable:$false] %s1409_s11 }
  0x6f   : > { %1109 = vmatpush3.bf16.msra.mxu0 %v1278_v1  ;;  %v1286_v15 = vld [vmem:[%s1689_s28 + $0x8] sm:$0xff]   ;;  %v1295_v18 = vld [vmem:[#allocation5 + $0x80] sm:$0xff]   ;;  %v1297_v20 = vld [vmem:[#allocation5 + $0x90] sm:$0xff]   ;;  %s1411_s25 = scalar_lea.vmem %s1410_s11, 512  ;;  %p1412_p7 = scmp.lt.s32.totalorder %s1718_s20, %s1410_s11 }
  0x70   : > { %1110 = vmatprep.subr.bf16.mxu0 %v1279_v2  ;;  %v1296_v19 = vld [vmem:[#allocation5 + $0x88] sm:$0xff]   ;;  %v1298_v21 = vld [vmem:[#allocation5 + $0x98] sm:$0xff]   ;;  %v1299_v22 = vld [vmem:[#allocation5 + $0xa0] sm:$0xff]   ;;  %p1408_p3 = pneg %p1407_p2  ;;  %p1413_p9 = scmp.lt.s32.totalorder %s1411_s25, %s1405_s22 }
  0x71   : > { %1129 = vmatpush3.bf16.msra.mxu1 %v1288_v6  ;;  %v1300_v23 = vld [vmem:[#allocation5 + $0xa8] sm:$0xff]   ;;  %v1704_v27 = vld [vmem:[#allocation7] sm:$0xff]  ;;  %v1301_v43 = vld [vmem:[#allocation5 + $0xb0] sm:$0xff]  }
  0x72   : > { %1130 = vmatprep.subr.bf16.mxu1 %v1289_v8  ;;  %v243_v28 = vrot.slane %v1704_v27, %v242_v26  ;;  %v1302_v44 = vld [vmem:[#allocation5 + $0xb8] sm:$0xff]   ;;  %v1303_v45 = vld [vmem:[#allocation5 + $0xc0] sm:$0xff]   ;;  %v1304_v46 = vld [vmem:[#allocation5 + $0xc8] sm:$0xff]   ;;  %v379_v52 = vrot.slane %v1704_v27, %v378_v51  ;;  %p1414_p12 = por %p1413_p9, %p1412_p7 }
  0x73   : > { %1111 = vmatpush3.bf16.msra.mxu0 %v1279_v2  ;;  %v1305_v47 = vld [vmem:[#allocation5 + $0xd0] sm:$0xff]   ;;  %v1306_v48 = vld [vmem:[#allocation5 + $0xd8] sm:$0xff]   ;;  %v1307_v49 = vld [vmem:[#allocation5 + $0xe0] sm:$0xff]  }
  0x74   : > { %1112 = vmatprep.subr.bf16.mxu0 %v1280_v3  ;;  %v1308_v50 = vld [vmem:[#allocation5 + $0xe8] sm:$0xff]   ;;  %v1310_v4 = vld [vmem:[#allocation5 + $0xf8] sm:$0xff]   ;;  %v1311_v5 = vld [vmem:[#allocation5 + $0x100] sm:$0xff]   ;;  %p1415_p1 = pnand %p1414_p12, %p1408_p3 }
  0x75   : > { %1131 = vmatpush3.bf16.msra.mxu1 %v1289_v8  ;;  %v1312_v6 = vld [vmem:[#allocation5 + $0x108] sm:$0xff]   ;;  %v1314_v8 = vld [vmem:[#allocation5 + $0x118] sm:$0xff]  }
  0x76   : > { %1132 = vmatprep.subr.bf16.mxu1 %v1290_v10 }
  0x77   : > { %1113 = vmatpush3.bf16.msra.mxu0 %v1280_v3  ;;  %v1309_v3 = vld [vmem:[#allocation5 + $0xf0] sm:$0xff]  }
  0x78   : > { %1114 = vmatprep.subr.bf16.mxu0 %v1281_v7 }
  0x79   : > { %1133 = vmatpush3.bf16.msra.mxu1 %v1290_v10  ;;  %v1316_v10 = vld [vmem:[#allocation5 + $0x128] sm:$0xff]  }
  0x7a   : > { %1134 = vmatprep.subr.bf16.mxu1 %v1291_v12 }
  0x7b   : > { %1115 = vmatpush3.bf16.msra.mxu0 %v1281_v7  ;;  %v1313_v7 = vld [vmem:[#allocation5 + $0x110] sm:$0xff]  }
  0x7c   : > { %1116 = vmatprep.subr.bf16.mxu0 %v1282_v9 }
  0x7d   : > { %1135 = vmatpush3.bf16.msra.mxu1 %v1291_v12 }
  0x7e   : > { %1136 = vmatprep.subr.bf16.mxu1 %v1292_v14 }
  0x7f   : > { %1117 = vmatpush3.bf16.msra.mxu0 %v1282_v9  ;;  %v1315_v9 = vld [vmem:[#allocation5 + $0x120] sm:$0xff]  }
  0x80   : > { %1118 = vmatprep.subr.bf16.mxu0 %v1283_v11 }
  0x81   : > { %1137 = vmatpush3.bf16.msra.mxu1 %v1292_v14 }
  0x82   : > { %1138 = vmatprep.subr.bf16.mxu1 %v1293_v16 }
  0x83   : > { %1119 = vmatpush3.bf16.msra.mxu0 %v1283_v11  ;;  %v502_v11 = vsub.s32 2, %v1701_v25 }
  0x84   : > { %1120 = vmatprep.subr.bf16.mxu0 %v1284_v13 }
  0x85   : > { %1139 = vmatpush3.bf16.msra.mxu1 %v1293_v16  ;;  %v503_v12 = vrot.slane %v1704_v27, %v502_v11 }
  0x86   : > { %1140 = vmatprep.subr.bf16.mxu1 %v1294_v17 }
  0x87   : > { %1121 = vmatpush3.bf16.msra.mxu0 %v1284_v13 }
  0x88   : > { %1146 = vmatprep.subr.bf16.mxu0 %v1295_v18 }
  0x89   : > { %1141 = vmatpush3.bf16.msra.mxu1 %v1294_v17 }
  0x8a   : > { %1123 = vmatmul.mubr.bf16.vlgmr.msra.gmra.mrb[0].mxu0 %v1286_v15  ;;  %1166 = vmatprep.subr.bf16.mxu1 %v1303_v45 }
  0x8b   : > { %1147 = vmatpush3.bf16.msra.mxu0 %v1295_v18 }
  0x8c   : > { %1148 = vmatprep.subr.bf16.mxu0 %v1296_v19 }
  0x8f   : > { %1149 = vmatpush3.bf16.msra.mxu0 %v1296_v19 }
  0x90   : > { %1150 = vmatprep.subr.bf16.mxu0 %v1297_v20 }
  0x93   : > { %1151 = vmatpush3.bf16.msra.mxu0 %v1297_v20 }
  0x94   : > { %1152 = vmatprep.subr.bf16.mxu0 %v1298_v21 }
  0x97   : > { %1153 = vmatpush3.bf16.msra.mxu0 %v1298_v21 }
  0x98   : > { %1154 = vmatprep.subr.bf16.mxu0 %v1299_v22 }
  0x9b   : > { %1155 = vmatpush3.bf16.msra.mxu0 %v1299_v22 }
  0x9c   : > { %1156 = vmatprep.subr.bf16.mxu0 %v1300_v23 }
  0x9f   : > { %1157 = vmatpush3.bf16.msra.mxu0 %v1300_v23 }
  0xa0   : > { %1158 = vmatprep.subr.bf16.mxu0 %v1301_v43 }
  0xa3   : > { %1159 = vmatpush3.bf16.msra.mxu0 %v1301_v43 }
  0xa4   : > { %1160 = vmatprep.subr.bf16.mxu0 %v1302_v44 }
  0xa7   : > { %1161 = vmatpush3.bf16.msra.mxu0 %v1302_v44 }
  0xa8   : > { %1186 = vmatprep.subr.bf16.mxu0 %v1311_v5 }
 0x15d   : > { %v1124_v29 = vpop.f32.mrb[0].mxu0 }
 0x15e   : > { %v347_v30 = vadd.f32 %v1124_v29, %v243_v28  ;;  %v338_v31 = vpop.f32.mrb[1].mxu0  ;;  %v1317_v29 = vld [vmem:[#allocation5 + $0x130] sm:$0xff]  }
 0x15f   : > { %v339_v32 = vadd.f32 %v338_v31, %v243_v28  ;;  %v1125_v33 = vpop.f32.mrb[2].mxu0  ;;  %v626_v31 = vsub.s32 3, %v1701_v25 }
 0x160   : > { %v350_v34 = vadd.f32 %v1125_v33, %v243_v28  ;;  %v341_v35 = vpop.f32.mrb[3].mxu0  ;;  %v355_v37 = vmax.f32 %v347_v30, 0.0  ;;  %v1318_v30 = vld [vmem:[#allocation5 + $0x138] sm:$0xff]  }
 0x161   : > { %v342_v36 = vadd.f32 %v341_v35, %v243_v28  ;;  %v353_v39 = vmax.f32 %v339_v32, 0.0  ;;  %v627_v32 = vrot.slane %v1704_v27, %v626_v31 }
 0x162   : > { %v356_v38 = vmax.f32 %v350_v34, 0.0 }
 0x163   : > { %v354_v40 = vmax.f32 %v342_v36, 0.0 }
 0x164   : > { %v358_v41 = vpack.c.bf16 %v356_v38, %v355_v37 }
 0x165   : > { %v357_v42 = vpack.c.bf16 %v354_v40, %v353_v39 }
 0x167   : > { %1142 = vmatprep.mubr.bf16.mxu1 %v357_v42 }
 0x168   : > { %1143 = vmatmul.mubr.bf16.vlgmr.msra.gmra.mrb[0].mxu1 %v358_v41 }
 0x169   : > { %1167 = vmatpush3.bf16.msra.mxu1 %v1303_v45 }
 0x16a   : > { %1168 = vmatprep.subr.bf16.mxu1 %v1304_v46 }
 0x16d   : > { %1169 = vmatpush3.bf16.msra.mxu1 %v1304_v46 }
 0x16e   : > { %1170 = vmatprep.subr.bf16.mxu1 %v1305_v47 }
 0x171   : > { %1171 = vmatpush3.bf16.msra.mxu1 %v1305_v47  ;;  %v750_v47 = vsub.s32 4, %v1701_v25 }
 0x172   : > { %1172 = vmatprep.subr.bf16.mxu1 %v1306_v48 }
 0x175   : > { %1173 = vmatpush3.bf16.msra.mxu1 %v1306_v48  ;;  %v751_v48 = vrot.slane %v1704_v27, %v750_v47 }
 0x176   : > { %1174 = vmatprep.subr.bf16.mxu1 %v1307_v49 }
 0x179   : > { %1175 = vmatpush3.bf16.msra.mxu1 %v1307_v49 }
 0x17a   : > { %1176 = vmatprep.subr.bf16.mxu1 %v1308_v50 }
 0x17d   : > { %1177 = vmatpush3.bf16.msra.mxu1 %v1308_v50 }
 0x17e   : > { %1178 = vmatprep.subr.bf16.mxu1 %v1309_v3 }
 0x181   : > { %1179 = vmatpush3.bf16.msra.mxu1 %v1309_v3 }
 0x182   : > { %1180 = vmatprep.subr.bf16.mxu1 %v1310_v4 }
 0x185   : > { %1181 = vmatpush3.bf16.msra.mxu1 %v1310_v4 }
 0x23b   : > { %v1144_v53 = vpop.f32.mrb[0].mxu1 }
 0x23c   : > { %v471_v54 = vadd.f32 %v1144_v53, %v379_v52  ;;  %v462_v55 = vpop.f32.mrb[1].mxu1 }
 0x23d   : > { %v463_v56 = vadd.f32 %v462_v55, %v379_v52  ;;  %v1145_v57 = vpop.f32.mrb[2].mxu1 }
 0x23e   : > { %v474_v58 = vadd.f32 %v1145_v57, %v379_v52  ;;  %v465_v59 = vpop.f32.mrb[3].mxu1  ;;  %v479_v61 = vmax.f32 %v471_v54, 0.0 }
 0x23f   : > { %v466_v60 = vadd.f32 %v465_v59, %v379_v52  ;;  %v477_v63 = vmax.f32 %v463_v56, 0.0 }
 0x240   : > { %v480_v62 = vmax.f32 %v474_v58, 0.0 }
 0x241   : > { %v478_v0 = vmax.f32 %v466_v60, 0.0 }
 0x242   : > { %v482_v1 = vpack.c.bf16 %v480_v62, %v479_v61 }
 0x243   : > { %v481_v2 = vpack.c.bf16 %v478_v0, %v477_v63 }
 0x245   : > { %1162 = vmatprep.mubr.bf16.mxu0 %v481_v2 }
 0x246   : > { %1163 = vmatmul.mubr.bf16.vlgmr.msra.gmra.mrb[4].mxu0 %v482_v1 }
 0x247   : > { %1187 = vmatpush3.bf16.msra.mxu0 %v1311_v5 }
 0x248   : > { %1188 = vmatprep.subr.bf16.mxu0 %v1312_v6 }
 0x24b   : > { %1189 = vmatpush3.bf16.msra.mxu0 %v1312_v6 }
 0x24c   : > { %1190 = vmatprep.subr.bf16.mxu0 %v1313_v7 }
 0x24f   : > { %1191 = vmatpush3.bf16.msra.mxu0 %v1313_v7 }
 0x250   : > { %1192 = vmatprep.subr.bf16.mxu0 %v1314_v8 }
 0x253   : > { %1193 = vmatpush3.bf16.msra.mxu0 %v1314_v8 }
 0x254   : > { %1194 = vmatprep.subr.bf16.mxu0 %v1315_v9 }
 0x257   : > { %1195 = vmatpush3.bf16.msra.mxu0 %v1315_v9 }
 0x258   : > { %1196 = vmatprep.subr.bf16.mxu0 %v1316_v10 }
 0x25b   : > { %1197 = vmatpush3.bf16.msra.mxu0 %v1316_v10 }
 0x25c   : > { %1198 = vmatprep.subr.bf16.mxu0 %v1317_v29 }
 0x25f   : > { %1199 = vmatpush3.bf16.msra.mxu0 %v1317_v29 }
 0x260   : > { %1200 = vmatprep.subr.bf16.mxu0 %v1318_v30 }
 0x263   : > { %1201 = vmatpush3.bf16.msra.mxu0 %v1318_v30 }
 0x319   : > { %v1164_v13 = vpop.f32.mrb[4].mxu0 }
 0x31a   : > { %v595_v14 = vadd.f32 %v1164_v13, %v503_v12  ;;  %v586_v15 = vpop.f32.mrb[5].mxu0 }
 0x31b   : > { %v587_v16 = vadd.f32 %v586_v15, %v503_v12  ;;  %v1165_v17 = vpop.f32.mrb[6].mxu0 }
 0x31c   : > { %v598_v18 = vadd.f32 %v1165_v17, %v503_v12  ;;  %v589_v19 = vpop.f32.mrb[7].mxu0  ;;  %v603_v21 = vmax.f32 %v595_v14, 0.0 }
 0x31d   : > { %v590_v20 = vadd.f32 %v589_v19, %v503_v12  ;;  %v601_v23 = vmax.f32 %v587_v16, 0.0 }
 0x31e   : > { %v604_v22 = vmax.f32 %v598_v18, 0.0 }
 0x31f   : > { %v602_v24 = vmax.f32 %v590_v20, 0.0 }
 0x320   : > { %v606_v26 = vpack.c.bf16 %v604_v22, %v603_v21 }
 0x321   : > { %v605_v28 = vpack.c.bf16 %v602_v24, %v601_v23 }
 0x323   : > { %1182 = vmatprep.mubr.bf16.mxu1 %v605_v28 }
 0x324   : > { %1183 = vmatmul.mubr.bf16.vlgmr.msra.gmra.mrb[4].mxu1 %v606_v26 }
 0x3f7   : > { %v1184_v33 = vpop.f32.mrb[4].mxu1 }
 0x3f8   : > { %v719_v34 = vadd.f32 %v1184_v33, %v627_v32  ;;  %v710_v35 = vpop.f32.mrb[5].mxu1 }
 0x3f9   : > { %v711_v36 = vadd.f32 %v710_v35, %v627_v32  ;;  %v1185_v37 = vpop.f32.mrb[6].mxu1 }
 0x3fa   : > { %v722_v38 = vadd.f32 %v1185_v37, %v627_v32  ;;  %v713_v39 = vpop.f32.mrb[7].mxu1  ;;  %v727_v41 = vmax.f32 %v719_v34, 0.0 }
 0x3fb   : > { %v714_v40 = vadd.f32 %v713_v39, %v627_v32  ;;  %v725_v43 = vmax.f32 %v711_v36, 0.0 }
 0x3fc   : > { %v728_v42 = vmax.f32 %v722_v38, 0.0 }
 0x3fd   : > { %v726_v44 = vmax.f32 %v714_v40, 0.0 }
 0x3fe   : > { %v730_v45 = vpack.c.bf16 %v728_v42, %v727_v41 }
 0x3ff   : > { %v729_v46 = vpack.c.bf16 %v726_v44, %v725_v43 }
 0x401   : > { %1202 = vmatprep.mubr.bf16.mxu0 %v729_v46 }
 0x402   : > { %1203 = vmatmul.mubr.bf16.vlgmr.msra.gmra.mrb[8].mxu0 %v730_v45 }
 0x4d5   : > { %v1204_v49 = vpop.f32.mrb[8].mxu0 }
 0x4d6   : > { %v834_v50 = vpop.f32.mrb[9].mxu0  ;;  %v843_v52 = vadd.f32 %v1204_v49, %v751_v48 }
 0x4d7   : > { %v1205_v51 = vpop.f32.mrb[10].mxu0  ;;  %v835_v55 = vadd.f32 %v834_v50, %v751_v48 }
 0x4d8   : > { %v846_v53 = vadd.f32 %v1205_v51, %v751_v48  ;;  %v837_v54 = vpop.f32.mrb[11].mxu0 }
 0x4d9   : > { %v838_v25 = vadd.f32 %v837_v54, %v751_v48 }
 0x4da   : > { %v1053_v27 = vpack.c.bf16 %v846_v53, %v843_v52 }
 0x4db   : > { %v1048_v56 = vpack.c.bf16 %v838_v25, %v835_v55 }
 0x4dc   : > { %1055 = vst [vmem:[%s215_s18 + $0x8] sm:$0xff] %v1053_v27  }
 0x4dd   : > { %1049 = vst [vmem:[%s215_s18] sm:$0xff] %v1048_v56  }
 0x4de   : > { %1418 = shalt.err (!%p1415_p1)
}
 0x4df   : > { %s1419_s10 = scalar_lea.hbm %s1723_s27, 256  ;;  %s1423_s26 = scalar_lea.hbm %s1770_s3, 512 }
 0x4e0   : > { %p1420_p13 = scmp.ne.s32.totalorder %s1723_s27, %s1419_s10  ;;  %p1424_p4 = scmp.lt.u32.totalorder %s1723_s27, %s1770_s3 }
 0x4e1   : > { %p1425_p5 = scmp.lt.u32.totalorder %s1423_s26, %s1419_s10  ;;  %p1427_p11 = scmp.lt.u32.totalorder %s1419_s10, %s1723_s27 }
 0x4e2   : > { %p1421_p6 = pnand %p1420_p13, %p1784_p0 }
 0x4e3   : > { %p1426_p8 = por %p1425_p5, %p1424_p4 }
 0x4e4   : > { %p1422_p10 = pneg %p1421_p6 }
 0x4e5   : > { %p1428_p2 = por %p1427_p11, %p1426_p8 }
 0x4e7   : > { %p1429_p3 = pnand %p1428_p2, %p1422_p10 }
 0x4e9   : > { %1432 = shalt.err (!%p1429_p3)
}
 0x4ea   : > { %s1483_s28 = smov 64   ;;  %s1484_s18 = smov 4  }
 0x4eb   : > { %1216 = dma.vmem_to_hbm [thread:$0]  (%p1784_p0), %s1718_s20, 256, %s1723_s27, %s870_s16, %s1483_s28, %s1483_s28, %s1484_s18  }
 0x4ec PF: > { %s898_s7 = sand.u32 1, %s1463_s12   ;;  %p1785_p7 = scmp.ne.s32.totalorder %s1775_s19, 0 }
 0x4ed   : > { %p1786_p9 = scmp.ge.s32.totalorder %s1475_s15, 2  ;;  %s899_s8 = scalar_lea.sflag [#allocation4], %s898_s7 }
 0x4ef   : > { %p1230_p12 = pnand %p1786_p9, %p1785_p7 }
 0x4f1   : > { %1458 = dma.done.wait (!%p1230_p12), %s899_s8, 256  }
 0x4f2   : > { %1460 = vsyncadd (!%p1230_p12), %s899_s8, 4294967040  ;;  %p17_p1 = scmp.ge.s32.totalorder %s1618_s4, 4   ;;  %s1787_s12 = smov %s1467_s13 }
 0x4f3   : > { %s1788_s13 = smov %s1471_s14  ;;  %s1789_s14 = smov %s1634_s9 }
 0x4f4   : > { %s1790_s15 = smov %s1618_s4  ;;  %19 = sbr.rel (!%p17_p1) target bundleno = 6 (0x6), region = 89 }
 0x4fb   :  { %904 = vsyncpa [#allocation3], 1 }
 0x4fc   :  { %906 = vsyncpa [#allocation3 + $0x1], 1 }
 0x4fd   :  { %907 = vsyncpa [#allocation6], 1 }
 0x4fe   :  { %908 = vsyncpa [#allocation4], 1 }
 0x4ff   :  { %910 = vsyncpa [#allocation4 + $0x1], 1 }

</bundles_post_ra>
